<compile_context>
chip_gen: v5e
topology: v5e:2x2
jax: 0.10.0
libtpu: 0.0.40
codegen_flags: <defaults>
</compile_context>

<pallas_src>
import jax
import jax.numpy as jnp
from jax.experimental import pallas as pl
from jax.experimental.pallas import tpu as pltpu

# ---------------- model config (small, deterministic) ----------------
B = 2          # batch
S = 8          # sequence length
H = 32         # hidden size
NH = 2         # attention heads
HD = H // NH   # head dim
F = 64         # FFN intermediate size
VOCAB = 100
N_LAYERS = 2
EPS = 1e-12
BS = B * S
OUT_LANES = 128          # lane-dense (padded) kernel output width

# packed per-layer vector-param layout: one parameter per sublane ROW of a
# (P_ROWS, P_LANES) slab, data always starting at lane 0 (no lane rotates).
R_BQ, R_BK, R_BV, R_BO = 0, 1, 2, 3
R_LN1G, R_LN1B = 4, 5
R_B1, R_B2 = 6, 7
R_LN2G, R_LN2B = 8, 9
P_ROWS, P_LANES = 16, 128


def _layer_norm(x, gamma, beta):
    # one-pass statistics: var = E[x^2] - E[x]^2 (saves one elementwise pass)
    mu = jnp.mean(x, axis=-1, keepdims=True)
    ex2 = jnp.mean(x * x, axis=-1, keepdims=True)
    var = jnp.maximum(ex2 - mu * mu, 0.0)
    return (x - mu) * jax.lax.rsqrt(var + EPS) * gamma + beta


def _mm(a, b):
    # bf16 MXU operands, f32 accumulation.
    return jnp.dot(a.astype(jnp.bfloat16), b.astype(jnp.bfloat16),
                   preferred_element_type=jnp.float32)


# ---------------- single fused Pallas kernel ----------------
def encoder_kernel(x_ref, mask_ref, embln_ref,
                   wq_ref, wk_ref, wv_ref, wo_ref, w1_ref, w2_ref, pvec_ref,
                   out_ref):
    """Fused synthetic-BERT forward + masked mean pooling (whole batch).

    x_ref:     (B*S, H)          token+position embeddings (pre-LN), f32
    mask_ref:  (B, S)            float attention mask
    embln_ref: (2, H)            row 0 = gamma, row 1 = beta (embedding LN)
    wq/wk/wv_ref: (L, H, H)      projection weights, bf16
    wo_ref:    (L, H, H)         attention output projection, bf16
    w1_ref:    (L, H, F)         FFN up, bf16
    w2_ref:    (L, F, H)         FFN down, bf16
    pvec_ref:  (L, 16, 128)      packed biases / LN params, one per sublane row
    out_ref:   (B, 128)          pooled embeddings, lane-padded (valid cols 0:H)
    """
    # embedding LayerNorm (in-kernel), f32
    x = _layer_norm(x_ref[...], embln_ref[0:1, :], embln_ref[1:2, :])   # (BS, H)

    # attention bias from the mask, broadcast ONCE to (B, S, S) and reused in
    # every layer/head (hoisted; JAX does not CSE broadcast_in_dim)
    mask = mask_ref[...]                                    # (B, S)
    bias_bss = jnp.broadcast_to(((1.0 - mask) * -1e9)[:, None, :], (B, S, S))
    scale = 1.0 / (HD ** 0.5)

    for li in range(N_LAYERS):                              # static unroll (only 2 layers)
        wq = wq_ref[li]                                     # (H, H) bf16
        wk = wk_ref[li]
        wv = wv_ref[li]
        wo = wo_ref[li]
        w1 = w1_ref[li]                                     # (H, F) bf16
        w2 = w2_ref[li]                                     # (F, H) bf16
        pv = pvec_ref[li]                                   # (16, 128) f32

        bq = pv[R_BQ:R_BQ + 1, 0:H]
        bk = pv[R_BK:R_BK + 1, 0:H]
        bv = pv[R_BV:R_BV + 1, 0:H]
        bo = pv[R_BO:R_BO + 1, 0:H]
        ln1g = pv[R_LN1G:R_LN1G + 1, 0:H]
        ln1b = pv[R_LN1B:R_LN1B + 1, 0:H]
        b1 = pv[R_B1:R_B1 + 1, 0:F]
        b2 = pv[R_B2:R_B2 + 1, 0:H]
        ln2g = pv[R_LN2G:R_LN2G + 1, 0:H]
        ln2b = pv[R_LN2B:R_LN2B + 1, 0:H]

        # separate Q/K/V projections over the flattened [B*S, H] batch
        # (lane-aligned outputs — no unaligned slicing of a fused QKV result)
        q = _mm(x, wq) + bq                                 # (BS, H) f32
        k = _mm(x, wk) + bk
        v = _mm(x, wv) + bv
        q3 = (q * scale).reshape(B, S, H)                   # fold score scale into Q once
        k3 = k.reshape(B, S, H)
        v3 = v.reshape(B, S, H)

        # attention: batched over B; each head folded directly through its
        # row-slice of Wo and summed (== concat(heads) @ Wo).
        attn = None
        for hh in range(NH):
            lo, hi = hh * HD, (hh + 1) * HD
            qh = q3[:, :, lo:hi]                            # (B, S, HD)
            kh = k3[:, :, lo:hi]
            vh = v3[:, :, lo:hi]
            s = jnp.einsum('bqd,bkd->bqk',
                           qh.astype(jnp.bfloat16), kh.astype(jnp.bfloat16),
                           preferred_element_type=jnp.float32) + bias_bss
            s = s - jnp.max(s, axis=-1, keepdims=True)
            p = jnp.exp(s)
            p = p * pl.reciprocal(jnp.sum(p, axis=-1, keepdims=True), approx=True)
            ctx = jnp.einsum('bqk,bkd->bqd',
                             p.astype(jnp.bfloat16), vh.astype(jnp.bfloat16),
                             preferred_element_type=jnp.float32)   # (B, S, HD)
            part = _mm(ctx.reshape(BS, HD), wo[lo:hi, :])          # (BS, H)
            attn = part if attn is None else attn + part
        attn = attn + bo

        # residual + LayerNorm 1
        h1 = _layer_norm(x + attn, ln1g, ln1b)

        # FFN
        f = _mm(h1, w1) + b1
        # TODO(synk): HuggingFace BERT default is exact erf GELU; tanh approx used here.
        f = jax.nn.gelu(f, approximate=True)
        f = _mm(f, w2) + b2

        # residual + LayerNorm 2 -> input to next layer
        x = _layer_norm(h1 + f, ln2g, ln2b)

    # masked mean pooling (exact divide — off the hot path)
    x3 = x.reshape(B, S, H)
    num = jnp.sum(x3 * mask[:, :, None], axis=1)            # (B, H)
    den = jnp.maximum(jnp.sum(mask, axis=1, keepdims=True), 1e-9)   # (B, 1)
    pooled = num / den                                      # (B, H)

    # lane-dense full-width store; valid data lives in cols 0:H
    out_ref[...] = jnp.concatenate(
        [pooled, jnp.zeros((B, OUT_LANES - H), jnp.float32)], axis=-1)


# ---------------- wrapper: one pallas_call, explicit VMEM placement ----------------
@jax.jit
def text_encoder_forward(input_ids, attention_mask, params):
    (tok_emb, pos_emb, emb_ln,
     wq_all, wk_all, wv_all, wo_all, w1_all, w2_all, pvec_all) = params

    # embedding gather + position embeddings (plain-JAX glue)
    x = jnp.take(tok_emb, input_ids, axis=0) + pos_emb[None, :, :]   # (B, S, H)
    x2 = x.reshape(BS, H).astype(jnp.float32)
    mask_f = attention_mask.astype(jnp.float32)                      # (B, S)

    vmem = pl.BlockSpec(memory_space=pltpu.MemorySpace.VMEM)
    out_padded = pl.pallas_call(
        encoder_kernel,
        out_shape=jax.ShapeDtypeStruct((B, OUT_LANES), jnp.float32),
        in_specs=[vmem] * 10,
        out_specs=vmem,
        compiler_params=pltpu.CompilerParams(vmem_limit_bytes=32 * 1024 * 1024),
    )(x2, mask_f, emb_ln,
      wq_all, wk_all, wv_all, wo_all, w1_all, w2_all, pvec_all)
    return out_padded[:, :H]


# ---------------- parameter construction (deterministic) ----------------
def init_params(key):
    keys = jax.random.split(key, 3 + N_LAYERS)
    tok_emb = jax.random.normal(keys[0], (VOCAB, H), jnp.float32) * 0.02
    pos_emb = jax.random.normal(keys[1], (S, H), jnp.float32) * 0.02
    emb_ln = jnp.concatenate([jnp.ones((1, H), jnp.float32),
                              jnp.zeros((1, H), jnp.float32)], axis=0)   # (2, H)

    wq_l, wk_l, wv_l, wo_l, w1_l, w2_l, pvec_l = [], [], [], [], [], [], []
    for li in range(N_LAYERS):
        lk = jax.random.split(keys[3 + li], 6)
        wq_l.append(jax.random.normal(lk[0], (H, H), jnp.float32) * 0.05)
        wk_l.append(jax.random.normal(lk[1], (H, H), jnp.float32) * 0.05)
        wv_l.append(jax.random.normal(lk[2], (H, H), jnp.float32) * 0.05)
        wo_l.append(jax.random.normal(lk[3], (H, H), jnp.float32) * 0.05)
        w1_l.append(jax.random.normal(lk[4], (H, F), jnp.float32) * 0.05)
        w2_l.append(jax.random.normal(lk[5], (F, H), jnp.float32) * 0.05)

        # packed 1-D params: one per sublane row, zero-padded to 128 lanes
        pvec = jnp.zeros((P_ROWS, P_LANES), jnp.float32)
        pvec = pvec.at[R_LN1G, 0:H].set(1.0)   # LN1 gamma
        pvec = pvec.at[R_LN2G, 0:H].set(1.0)   # LN2 gamma
        # all biases / betas zero (BERT-style init)
        pvec_l.append(pvec)

    def stack_bf16(lst):
        # weight matrices stored in bf16 (MXU operands); everything else f32
        return jnp.stack(lst).astype(jnp.bfloat16)

    return (tok_emb, pos_emb, emb_ln,
            stack_bf16(wq_l), stack_bf16(wk_l), stack_bf16(wv_l),
            stack_bf16(wo_l), stack_bf16(w1_l), stack_bf16(w2_l),
            jnp.stack(pvec_l))


if __name__ == "__main__":
    key = jax.random.PRNGKey(0)
    pkey, ikey = jax.random.split(key)
    params = init_params(pkey)

    input_ids = jax.random.randint(ikey, (B, S), 0, VOCAB, dtype=jnp.int32)
    # deterministic padding mask: first sequence fully valid, second half-padded
    attention_mask = jnp.array(
        [[1] * S,
         [1] * (S // 2) + [0] * (S - S // 2)], dtype=jnp.int32)

    out = text_encoder_forward(input_ids, attention_mask, params)
    jax.block_until_ready(out)
    assert out.shape == (B, H) and out.dtype == jnp.float32
    print("KERNEL_OK")
</pallas_src>

<mosaic_0001>
module attributes {stable_mosaic.version = 11 : i64} {
  func.func @encoder_kernel(%arg0: memref<16x32xf32, #tpu.memory_space<vmem>>, %arg1: memref<2x8xf32, #tpu.memory_space<vmem>>, %arg2: memref<2x32xf32, #tpu.memory_space<vmem>>, %arg3: memref<2x32x32xbf16, #tpu.memory_space<vmem>>, %arg4: memref<2x32x32xbf16, #tpu.memory_space<vmem>>, %arg5: memref<2x32x32xbf16, #tpu.memory_space<vmem>>, %arg6: memref<2x32x32xbf16, #tpu.memory_space<vmem>>, %arg7: memref<2x32x64xbf16, #tpu.memory_space<vmem>>, %arg8: memref<2x64x32xbf16, #tpu.memory_space<vmem>>, %arg9: memref<2x16x128xf32, #tpu.memory_space<vmem>>, %arg10: memref<2x128xf32, #tpu.memory_space<vmem>>) attributes {dimension_semantics = [], scalar_prefetch = 0 : i64, scratch_operands = 0 : i64, tpu.core_type = #tpu.core_type<tc>} {
    %c0 = arith.constant 0 : index
    %c0_0 = arith.constant 0 : index
    %0 = vector.load %arg0[%c0, %c0_0] : memref<16x32xf32, #tpu.memory_space<vmem>>, vector<16x32xf32>
    %c0_1 = arith.constant 0 : index
    %c0_2 = arith.constant 0 : index
    %1 = vector.load %arg2[%c0_1, %c0_2] : memref<2x32xf32, #tpu.memory_space<vmem>>, vector<1x32xf32>
    %c1 = arith.constant 1 : index
    %c0_3 = arith.constant 0 : index
    %2 = vector.load %arg2[%c1, %c0_3] : memref<2x32xf32, #tpu.memory_space<vmem>>, vector<1x32xf32>
    %cst = arith.constant dense<0.000000e+00> : vector<16xf32>
    %3 = vector.multi_reduction <add>, %0, %cst [1] : vector<16x32xf32> to vector<16xf32>
    %4 = vector.shape_cast %3 : vector<16xf32> to vector<16x1xf32>
    %cst_4 = arith.constant 3.200000e+01 : f32
    %5 = vector.broadcast %cst_4 : f32 to vector<16x1xf32>
    %6 = arith.divf %4, %5 : vector<16x1xf32>
    %7 = arith.mulf %0, %0 : vector<16x32xf32>
    %cst_5 = arith.constant dense<0.000000e+00> : vector<16xf32>
    %8 = vector.multi_reduction <add>, %7, %cst_5 [1] : vector<16x32xf32> to vector<16xf32>
    %9 = vector.shape_cast %8 : vector<16xf32> to vector<16x1xf32>
    %cst_6 = arith.constant 3.200000e+01 : f32
    %10 = vector.broadcast %cst_6 : f32 to vector<16x1xf32>
    %11 = arith.divf %9, %10 : vector<16x1xf32>
    %12 = arith.mulf %6, %6 : vector<16x1xf32>
    %13 = arith.subf %11, %12 : vector<16x1xf32>
    %cst_7 = arith.constant 0.000000e+00 : f32
    %14 = vector.broadcast %cst_7 : f32 to vector<16x1xf32>
    %15 = arith.maximumf %13, %14 : vector<16x1xf32>
    %16 = vector.broadcast %6 : vector<16x1xf32> to vector<16x32xf32>
    %17 = arith.subf %0, %16 : vector<16x32xf32>
    %cst_8 = arith.constant 9.99999996E-13 : f32
    %18 = vector.broadcast %cst_8 : f32 to vector<16x1xf32>
    %19 = arith.addf %15, %18 : vector<16x1xf32>
    %20 = math.rsqrt %19 : vector<16x1xf32>
    %21 = vector.broadcast %20 : vector<16x1xf32> to vector<16x32xf32>
    %22 = arith.mulf %17, %21 : vector<16x32xf32>
    %23 = vector.broadcast %1 : vector<1x32xf32> to vector<16x32xf32>
    %24 = arith.mulf %22, %23 : vector<16x32xf32>
    %25 = vector.broadcast %2 : vector<1x32xf32> to vector<16x32xf32>
    %26 = arith.addf %24, %25 : vector<16x32xf32>
    %c0_9 = arith.constant 0 : index
    %c0_10 = arith.constant 0 : index
    %27 = vector.load %arg1[%c0_9, %c0_10] : memref<2x8xf32, #tpu.memory_space<vmem>>, vector<2x8xf32>
    %cst_11 = arith.constant 1.000000e+00 : f32
    %28 = vector.broadcast %cst_11 : f32 to vector<2x8xf32>
    %29 = arith.subf %28, %27 : vector<2x8xf32>
    %cst_12 = arith.constant -1.000000e+09 : f32
    %30 = vector.broadcast %cst_12 : f32 to vector<2x8xf32>
    %31 = arith.mulf %29, %30 : vector<2x8xf32>
    %32 = vector.shape_cast %31 : vector<2x8xf32> to vector<2x1x8xf32>
    %33 = vector.shape_cast %32 : vector<2x1x8xf32> to vector<2x1x8xf32>
    %34 = vector.broadcast %33 : vector<2x1x8xf32> to vector<2x8x8xf32>
    %c0_13 = arith.constant 0 : index
    %c0_14 = arith.constant 0 : index
    %c0_15 = arith.constant 0 : index
    %35 = vector.load %arg3[%c0_13, %c0_14, %c0_15] : memref<2x32x32xbf16, #tpu.memory_space<vmem>>, vector<1x32x32xbf16>
    %36 = vector.shape_cast %35 : vector<1x32x32xbf16> to vector<32x32xbf16>
    %c0_16 = arith.constant 0 : index
    %c0_17 = arith.constant 0 : index
    %c0_18 = arith.constant 0 : index
    %37 = vector.load %arg4[%c0_16, %c0_17, %c0_18] : memref<2x32x32xbf16, #tpu.memory_space<vmem>>, vector<1x32x32xbf16>
    %38 = vector.shape_cast %37 : vector<1x32x32xbf16> to vector<32x32xbf16>
    %c0_19 = arith.constant 0 : index
    %c0_20 = arith.constant 0 : index
    %c0_21 = arith.constant 0 : index
    %39 = vector.load %arg5[%c0_19, %c0_20, %c0_21] : memref<2x32x32xbf16, #tpu.memory_space<vmem>>, vector<1x32x32xbf16>
    %40 = vector.shape_cast %39 : vector<1x32x32xbf16> to vector<32x32xbf16>
    %c0_22 = arith.constant 0 : index
    %c0_23 = arith.constant 0 : index
    %c0_24 = arith.constant 0 : index
    %41 = vector.load %arg6[%c0_22, %c0_23, %c0_24] : memref<2x32x32xbf16, #tpu.memory_space<vmem>>, vector<1x32x32xbf16>
    %42 = vector.shape_cast %41 : vector<1x32x32xbf16> to vector<32x32xbf16>
    %c0_25 = arith.constant 0 : index
    %c0_26 = arith.constant 0 : index
    %c0_27 = arith.constant 0 : index
    %43 = vector.load %arg7[%c0_25, %c0_26, %c0_27] : memref<2x32x64xbf16, #tpu.memory_space<vmem>>, vector<1x32x64xbf16>
    %44 = vector.shape_cast %43 : vector<1x32x64xbf16> to vector<32x64xbf16>
    %c0_28 = arith.constant 0 : index
    %c0_29 = arith.constant 0 : index
    %c0_30 = arith.constant 0 : index
    %45 = vector.load %arg8[%c0_28, %c0_29, %c0_30] : memref<2x64x32xbf16, #tpu.memory_space<vmem>>, vector<1x64x32xbf16>
    %46 = vector.shape_cast %45 : vector<1x64x32xbf16> to vector<64x32xbf16>
    %c0_31 = arith.constant 0 : index
    %c0_32 = arith.constant 0 : index
    %c0_33 = arith.constant 0 : index
    %47 = vector.load %arg9[%c0_31, %c0_32, %c0_33] : memref<2x16x128xf32, #tpu.memory_space<vmem>>, vector<1x16x128xf32>
    %48 = vector.shape_cast %47 : vector<1x16x128xf32> to vector<16x128xf32>
    %49 = vector.extract_strided_slice %48 {offsets = [0, 0], sizes = [1, 32], strides = [1, 1]} : vector<16x128xf32> to vector<1x32xf32>
    %50 = vector.extract_strided_slice %48 {offsets = [1, 0], sizes = [1, 32], strides = [1, 1]} : vector<16x128xf32> to vector<1x32xf32>
    %51 = vector.extract_strided_slice %48 {offsets = [2, 0], sizes = [1, 32], strides = [1, 1]} : vector<16x128xf32> to vector<1x32xf32>
    %52 = vector.extract_strided_slice %48 {offsets = [3, 0], sizes = [1, 32], strides = [1, 1]} : vector<16x128xf32> to vector<1x32xf32>
    %53 = vector.extract_strided_slice %48 {offsets = [4, 0], sizes = [1, 32], strides = [1, 1]} : vector<16x128xf32> to vector<1x32xf32>
    %54 = vector.extract_strided_slice %48 {offsets = [5, 0], sizes = [1, 32], strides = [1, 1]} : vector<16x128xf32> to vector<1x32xf32>
    %55 = vector.extract_strided_slice %48 {offsets = [6, 0], sizes = [1, 64], strides = [1, 1]} : vector<16x128xf32> to vector<1x64xf32>
    %56 = vector.extract_strided_slice %48 {offsets = [7, 0], sizes = [1, 32], strides = [1, 1]} : vector<16x128xf32> to vector<1x32xf32>
    %57 = vector.extract_strided_slice %48 {offsets = [8, 0], sizes = [1, 32], strides = [1, 1]} : vector<16x128xf32> to vector<1x32xf32>
    %58 = vector.extract_strided_slice %48 {offsets = [9, 0], sizes = [1, 32], strides = [1, 1]} : vector<16x128xf32> to vector<1x32xf32>
    %59 = arith.truncf %26 : vector<16x32xf32> to vector<16x32xbf16>
    %cst_34 = arith.constant dense<0.000000e+00> : vector<16x32xf32>
    %60 = tpu.matmul %59, %36, %cst_34 {dimension_numbers = #tpu.dot_dimension_numbers<[1], [0], [0], [1], [0, 0, 1, 1], [], []>} : vector<16x32xbf16>, vector<32x32xbf16>, vector<16x32xf32> -> vector<16x32xf32>
    %61 = vector.broadcast %49 : vector<1x32xf32> to vector<16x32xf32>
    %62 = arith.addf %60, %61 : vector<16x32xf32>
    %63 = arith.truncf %26 : vector<16x32xf32> to vector<16x32xbf16>
    %cst_35 = arith.constant dense<0.000000e+00> : vector<16x32xf32>
    %64 = tpu.matmul %63, %38, %cst_35 {dimension_numbers = #tpu.dot_dimension_numbers<[1], [0], [0], [1], [0, 0, 1, 1], [], []>} : vector<16x32xbf16>, vector<32x32xbf16>, vector<16x32xf32> -> vector<16x32xf32>
    %65 = vector.broadcast %50 : vector<1x32xf32> to vector<16x32xf32>
    %66 = arith.addf %64, %65 : vector<16x32xf32>
    %67 = arith.truncf %26 : vector<16x32xf32> to vector<16x32xbf16>
    %cst_36 = arith.constant dense<0.000000e+00> : vector<16x32xf32>
    %68 = tpu.matmul %67, %40, %cst_36 {dimension_numbers = #tpu.dot_dimension_numbers<[1], [0], [0], [1], [0, 0, 1, 1], [], []>} : vector<16x32xbf16>, vector<32x32xbf16>, vector<16x32xf32> -> vector<16x32xf32>
    %69 = vector.broadcast %51 : vector<1x32xf32> to vector<16x32xf32>
    %70 = arith.addf %68, %69 : vector<16x32xf32>
    %cst_37 = arith.constant 2.500000e-01 : f32
    %71 = vector.broadcast %cst_37 : f32 to vector<16x32xf32>
    %72 = arith.mulf %62, %71 : vector<16x32xf32>
    %73 = vector.shape_cast %72 : vector<16x32xf32> to vector<2x8x32xf32>
    %74 = vector.shape_cast %66 : vector<16x32xf32> to vector<2x8x32xf32>
    %75 = vector.shape_cast %70 : vector<16x32xf32> to vector<2x8x32xf32>
    %76 = vector.extract_strided_slice %73 {offsets = [0, 0, 0], sizes = [2, 8, 16], strides = [1, 1, 1]} : vector<2x8x32xf32> to vector<2x8x16xf32>
    %77 = vector.extract_strided_slice %74 {offsets = [0, 0, 0], sizes = [2, 8, 16], strides = [1, 1, 1]} : vector<2x8x32xf32> to vector<2x8x16xf32>
    %78 = vector.extract_strided_slice %75 {offsets = [0, 0, 0], sizes = [2, 8, 16], strides = [1, 1, 1]} : vector<2x8x32xf32> to vector<2x8x16xf32>
    %79 = arith.truncf %76 : vector<2x8x16xf32> to vector<2x8x16xbf16>
    %80 = arith.truncf %77 : vector<2x8x16xf32> to vector<2x8x16xbf16>
    "tpu.trace_start"() <{level = 10 : i32, message = "bqd,bkd->bqk"}> : () -> ()
    %cst_38 = arith.constant dense<0.000000e+00> : vector<2x8x8xf32>
    %81 = tpu.matmul %79, %80, %cst_38 {dimension_numbers = #tpu.dot_dimension_numbers<[2], [2], [1], [1], [0, 0, 0, 1, 1, 1], [0], [0]>} : vector<2x8x16xbf16>, vector<2x8x16xbf16>, vector<2x8x8xf32> -> vector<2x8x8xf32>
    "tpu.trace_stop"() : () -> ()
    %82 = arith.addf %81, %34 : vector<2x8x8xf32>
    %cst_39 = arith.constant dense<0xFF800000> : vector<2x8xf32>
    %83 = vector.multi_reduction <maximumf>, %82, %cst_39 [2] : vector<2x8x8xf32> to vector<2x8xf32>
    %84 = vector.shape_cast %83 : vector<2x8xf32> to vector<2x8x1xf32>
    %85 = vector.broadcast %84 : vector<2x8x1xf32> to vector<2x8x8xf32>
    %86 = arith.subf %82, %85 : vector<2x8x8xf32>
    %87 = math.exp %86 : vector<2x8x8xf32>
    %cst_40 = arith.constant dense<0.000000e+00> : vector<2x8xf32>
    %88 = vector.multi_reduction <add>, %87, %cst_40 [2] : vector<2x8x8xf32> to vector<2x8xf32>
    %89 = vector.shape_cast %88 : vector<2x8xf32> to vector<2x8x1xf32>
    %90 = tpu.reciprocal %89 {approx = true} : vector<2x8x1xf32> -> vector<2x8x1xf32>
    %91 = vector.broadcast %90 : vector<2x8x1xf32> to vector<2x8x8xf32>
    %92 = arith.mulf %87, %91 : vector<2x8x8xf32>
    %93 = arith.truncf %92 : vector<2x8x8xf32> to vector<2x8x8xbf16>
    %94 = arith.truncf %78 : vector<2x8x16xf32> to vector<2x8x16xbf16>
    "tpu.trace_start"() <{level = 10 : i32, message = "bqk,bkd->bqd"}> : () -> ()
    %cst_41 = arith.constant dense<0.000000e+00> : vector<2x8x16xf32>
    %95 = tpu.matmul %93, %94, %cst_41 {dimension_numbers = #tpu.dot_dimension_numbers<[2], [1], [1], [2], [0, 0, 0, 1, 1, 2], [0], [0]>} : vector<2x8x8xbf16>, vector<2x8x16xbf16>, vector<2x8x16xf32> -> vector<2x8x16xf32>
    "tpu.trace_stop"() : () -> ()
    %96 = vector.shape_cast %95 : vector<2x8x16xf32> to vector<16x16xf32>
    %97 = vector.extract_strided_slice %42 {offsets = [0, 0], sizes = [16, 32], strides = [1, 1]} : vector<32x32xbf16> to vector<16x32xbf16>
    %98 = arith.truncf %96 : vector<16x16xf32> to vector<16x16xbf16>
    %cst_42 = arith.constant dense<0.000000e+00> : vector<16x32xf32>
    %99 = tpu.matmul %98, %97, %cst_42 {dimension_numbers = #tpu.dot_dimension_numbers<[1], [0], [0], [1], [0, 0, 1, 1], [], []>} : vector<16x16xbf16>, vector<16x32xbf16>, vector<16x32xf32> -> vector<16x32xf32>
    %100 = vector.extract_strided_slice %73 {offsets = [0, 0, 16], sizes = [2, 8, 16], strides = [1, 1, 1]} : vector<2x8x32xf32> to vector<2x8x16xf32>
    %101 = vector.extract_strided_slice %74 {offsets = [0, 0, 16], sizes = [2, 8, 16], strides = [1, 1, 1]} : vector<2x8x32xf32> to vector<2x8x16xf32>
    %102 = vector.extract_strided_slice %75 {offsets = [0, 0, 16], sizes = [2, 8, 16], strides = [1, 1, 1]} : vector<2x8x32xf32> to vector<2x8x16xf32>
    %103 = arith.truncf %100 : vector<2x8x16xf32> to vector<2x8x16xbf16>
    %104 = arith.truncf %101 : vector<2x8x16xf32> to vector<2x8x16xbf16>
    "tpu.trace_start"() <{level = 10 : i32, message = "bqd,bkd->bqk"}> : () -> ()
    %cst_43 = arith.constant dense<0.000000e+00> : vector<2x8x8xf32>
    %105 = tpu.matmul %103, %104, %cst_43 {dimension_numbers = #tpu.dot_dimension_numbers<[2], [2], [1], [1], [0, 0, 0, 1, 1, 1], [0], [0]>} : vector<2x8x16xbf16>, vector<2x8x16xbf16>, vector<2x8x8xf32> -> vector<2x8x8xf32>
    "tpu.trace_stop"() : () -> ()
    %106 = arith.addf %105, %34 : vector<2x8x8xf32>
    %cst_44 = arith.constant dense<0xFF800000> : vector<2x8xf32>
    %107 = vector.multi_reduction <maximumf>, %106, %cst_44 [2] : vector<2x8x8xf32> to vector<2x8xf32>
    %108 = vector.shape_cast %107 : vector<2x8xf32> to vector<2x8x1xf32>
    %109 = vector.broadcast %108 : vector<2x8x1xf32> to vector<2x8x8xf32>
    %110 = arith.subf %106, %109 : vector<2x8x8xf32>
    %111 = math.exp %110 : vector<2x8x8xf32>
    %cst_45 = arith.constant dense<0.000000e+00> : vector<2x8xf32>
    %112 = vector.multi_reduction <add>, %111, %cst_45 [2] : vector<2x8x8xf32> to vector<2x8xf32>
    %113 = vector.shape_cast %112 : vector<2x8xf32> to vector<2x8x1xf32>
    %114 = tpu.reciprocal %113 {approx = true} : vector<2x8x1xf32> -> vector<2x8x1xf32>
    %115 = vector.broadcast %114 : vector<2x8x1xf32> to vector<2x8x8xf32>
    %116 = arith.mulf %111, %115 : vector<2x8x8xf32>
    %117 = arith.truncf %116 : vector<2x8x8xf32> to vector<2x8x8xbf16>
    %118 = arith.truncf %102 : vector<2x8x16xf32> to vector<2x8x16xbf16>
    "tpu.trace_start"() <{level = 10 : i32, message = "bqk,bkd->bqd"}> : () -> ()
    %cst_46 = arith.constant dense<0.000000e+00> : vector<2x8x16xf32>
    %119 = tpu.matmul %117, %118, %cst_46 {dimension_numbers = #tpu.dot_dimension_numbers<[2], [1], [1], [2], [0, 0, 0, 1, 1, 2], [0], [0]>} : vector<2x8x8xbf16>, vector<2x8x16xbf16>, vector<2x8x16xf32> -> vector<2x8x16xf32>
    "tpu.trace_stop"() : () -> ()
    %120 = vector.shape_cast %119 : vector<2x8x16xf32> to vector<16x16xf32>
    %121 = vector.extract_strided_slice %42 {offsets = [16, 0], sizes = [16, 32], strides = [1, 1]} : vector<32x32xbf16> to vector<16x32xbf16>
    %122 = arith.truncf %120 : vector<16x16xf32> to vector<16x16xbf16>
    %cst_47 = arith.constant dense<0.000000e+00> : vector<16x32xf32>
    %123 = tpu.matmul %122, %121, %cst_47 {dimension_numbers = #tpu.dot_dimension_numbers<[1], [0], [0], [1], [0, 0, 1, 1], [], []>} : vector<16x16xbf16>, vector<16x32xbf16>, vector<16x32xf32> -> vector<16x32xf32>
    %124 = arith.addf %99, %123 : vector<16x32xf32>
    %125 = vector.broadcast %52 : vector<1x32xf32> to vector<16x32xf32>
    %126 = arith.addf %124, %125 : vector<16x32xf32>
    %127 = arith.addf %26, %126 : vector<16x32xf32>
    %cst_48 = arith.constant dense<0.000000e+00> : vector<16xf32>
    %128 = vector.multi_reduction <add>, %127, %cst_48 [1] : vector<16x32xf32> to vector<16xf32>
    %129 = vector.shape_cast %128 : vector<16xf32> to vector<16x1xf32>
    %cst_49 = arith.constant 3.200000e+01 : f32
    %130 = vector.broadcast %cst_49 : f32 to vector<16x1xf32>
    %131 = arith.divf %129, %130 : vector<16x1xf32>
    %132 = arith.mulf %127, %127 : vector<16x32xf32>
    %cst_50 = arith.constant dense<0.000000e+00> : vector<16xf32>
    %133 = vector.multi_reduction <add>, %132, %cst_50 [1] : vector<16x32xf32> to vector<16xf32>
    %134 = vector.shape_cast %133 : vector<16xf32> to vector<16x1xf32>
    %cst_51 = arith.constant 3.200000e+01 : f32
    %135 = vector.broadcast %cst_51 : f32 to vector<16x1xf32>
    %136 = arith.divf %134, %135 : vector<16x1xf32>
    %137 = arith.mulf %131, %131 : vector<16x1xf32>
    %138 = arith.subf %136, %137 : vector<16x1xf32>
    %cst_52 = arith.constant 0.000000e+00 : f32
    %139 = vector.broadcast %cst_52 : f32 to vector<16x1xf32>
    %140 = arith.maximumf %138, %139 : vector<16x1xf32>
    %141 = vector.broadcast %131 : vector<16x1xf32> to vector<16x32xf32>
    %142 = arith.subf %127, %141 : vector<16x32xf32>
    %cst_53 = arith.constant 9.99999996E-13 : f32
    %143 = vector.broadcast %cst_53 : f32 to vector<16x1xf32>
    %144 = arith.addf %140, %143 : vector<16x1xf32>
    %145 = math.rsqrt %144 : vector<16x1xf32>
    %146 = vector.broadcast %145 : vector<16x1xf32> to vector<16x32xf32>
    %147 = arith.mulf %142, %146 : vector<16x32xf32>
    %148 = vector.broadcast %53 : vector<1x32xf32> to vector<16x32xf32>
    %149 = arith.mulf %147, %148 : vector<16x32xf32>
    %150 = vector.broadcast %54 : vector<1x32xf32> to vector<16x32xf32>
    %151 = arith.addf %149, %150 : vector<16x32xf32>
    %152 = arith.truncf %151 : vector<16x32xf32> to vector<16x32xbf16>
    %cst_54 = arith.constant dense<0.000000e+00> : vector<16x64xf32>
    %153 = tpu.matmul %152, %44, %cst_54 {dimension_numbers = #tpu.dot_dimension_numbers<[1], [0], [0], [1], [0, 0, 1, 1], [], []>} : vector<16x32xbf16>, vector<32x64xbf16>, vector<16x64xf32> -> vector<16x64xf32>
    %154 = vector.broadcast %55 : vector<1x64xf32> to vector<16x64xf32>
    %155 = arith.addf %153, %154 : vector<16x64xf32>
    %156 = arith.mulf %155, %155 : vector<16x64xf32>
    %157 = arith.mulf %155, %156 : vector<16x64xf32>
    %cst_55 = arith.constant 4.471500e-02 : f32
    %158 = vector.broadcast %cst_55 : f32 to vector<16x64xf32>
    %159 = arith.mulf %158, %157 : vector<16x64xf32>
    %160 = arith.addf %155, %159 : vector<16x64xf32>
    %cst_56 = arith.constant 0.797884583 : f32
    %161 = vector.broadcast %cst_56 : f32 to vector<16x64xf32>
    %162 = arith.mulf %161, %160 : vector<16x64xf32>
    %163 = math.tanh %162 : vector<16x64xf32>
    %cst_57 = arith.constant 1.000000e+00 : f32
    %164 = vector.broadcast %cst_57 : f32 to vector<16x64xf32>
    %165 = arith.addf %164, %163 : vector<16x64xf32>
    %cst_58 = arith.constant 5.000000e-01 : f32
    %166 = vector.broadcast %cst_58 : f32 to vector<16x64xf32>
    %167 = arith.mulf %166, %165 : vector<16x64xf32>
    %168 = arith.mulf %155, %167 : vector<16x64xf32>
    %169 = arith.truncf %168 : vector<16x64xf32> to vector<16x64xbf16>
    %cst_59 = arith.constant dense<0.000000e+00> : vector<16x32xf32>
    %170 = tpu.matmul %169, %46, %cst_59 {dimension_numbers = #tpu.dot_dimension_numbers<[1], [0], [0], [1], [0, 0, 1, 1], [], []>} : vector<16x64xbf16>, vector<64x32xbf16>, vector<16x32xf32> -> vector<16x32xf32>
    %171 = vector.broadcast %56 : vector<1x32xf32> to vector<16x32xf32>
    %172 = arith.addf %170, %171 : vector<16x32xf32>
    %173 = arith.addf %151, %172 : vector<16x32xf32>
    %cst_60 = arith.constant dense<0.000000e+00> : vector<16xf32>
    %174 = vector.multi_reduction <add>, %173, %cst_60 [1] : vector<16x32xf32> to vector<16xf32>
    %175 = vector.shape_cast %174 : vector<16xf32> to vector<16x1xf32>
    %cst_61 = arith.constant 3.200000e+01 : f32
    %176 = vector.broadcast %cst_61 : f32 to vector<16x1xf32>
    %177 = arith.divf %175, %176 : vector<16x1xf32>
    %178 = arith.mulf %173, %173 : vector<16x32xf32>
    %cst_62 = arith.constant dense<0.000000e+00> : vector<16xf32>
    %179 = vector.multi_reduction <add>, %178, %cst_62 [1] : vector<16x32xf32> to vector<16xf32>
    %180 = vector.shape_cast %179 : vector<16xf32> to vector<16x1xf32>
    %cst_63 = arith.constant 3.200000e+01 : f32
    %181 = vector.broadcast %cst_63 : f32 to vector<16x1xf32>
    %182 = arith.divf %180, %181 : vector<16x1xf32>
    %183 = arith.mulf %177, %177 : vector<16x1xf32>
    %184 = arith.subf %182, %183 : vector<16x1xf32>
    %cst_64 = arith.constant 0.000000e+00 : f32
    %185 = vector.broadcast %cst_64 : f32 to vector<16x1xf32>
    %186 = arith.maximumf %184, %185 : vector<16x1xf32>
    %187 = vector.broadcast %177 : vector<16x1xf32> to vector<16x32xf32>
    %188 = arith.subf %173, %187 : vector<16x32xf32>
    %cst_65 = arith.constant 9.99999996E-13 : f32
    %189 = vector.broadcast %cst_65 : f32 to vector<16x1xf32>
    %190 = arith.addf %186, %189 : vector<16x1xf32>
    %191 = math.rsqrt %190 : vector<16x1xf32>
    %192 = vector.broadcast %191 : vector<16x1xf32> to vector<16x32xf32>
    %193 = arith.mulf %188, %192 : vector<16x32xf32>
    %194 = vector.broadcast %57 : vector<1x32xf32> to vector<16x32xf32>
    %195 = arith.mulf %193, %194 : vector<16x32xf32>
    %196 = vector.broadcast %58 : vector<1x32xf32> to vector<16x32xf32>
    %197 = arith.addf %195, %196 : vector<16x32xf32>
    %c1_66 = arith.constant 1 : index
    %c0_67 = arith.constant 0 : index
    %c0_68 = arith.constant 0 : index
    %198 = vector.load %arg3[%c1_66, %c0_67, %c0_68] : memref<2x32x32xbf16, #tpu.memory_space<vmem>>, vector<1x32x32xbf16>
    %199 = vector.shape_cast %198 : vector<1x32x32xbf16> to vector<32x32xbf16>
    %c1_69 = arith.constant 1 : index
    %c0_70 = arith.constant 0 : index
    %c0_71 = arith.constant 0 : index
    %200 = vector.load %arg4[%c1_69, %c0_70, %c0_71] : memref<2x32x32xbf16, #tpu.memory_space<vmem>>, vector<1x32x32xbf16>
    %201 = vector.shape_cast %200 : vector<1x32x32xbf16> to vector<32x32xbf16>
    %c1_72 = arith.constant 1 : index
    %c0_73 = arith.constant 0 : index
    %c0_74 = arith.constant 0 : index
    %202 = vector.load %arg5[%c1_72, %c0_73, %c0_74] : memref<2x32x32xbf16, #tpu.memory_space<vmem>>, vector<1x32x32xbf16>
    %203 = vector.shape_cast %202 : vector<1x32x32xbf16> to vector<32x32xbf16>
    %c1_75 = arith.constant 1 : index
    %c0_76 = arith.constant 0 : index
    %c0_77 = arith.constant 0 : index
    %204 = vector.load %arg6[%c1_75, %c0_76, %c0_77] : memref<2x32x32xbf16, #tpu.memory_space<vmem>>, vector<1x32x32xbf16>
    %205 = vector.shape_cast %204 : vector<1x32x32xbf16> to vector<32x32xbf16>
    %c1_78 = arith.constant 1 : index
    %c0_79 = arith.constant 0 : index
    %c0_80 = arith.constant 0 : index
    %206 = vector.load %arg7[%c1_78, %c0_79, %c0_80] : memref<2x32x64xbf16, #tpu.memory_space<vmem>>, vector<1x32x64xbf16>
    %207 = vector.shape_cast %206 : vector<1x32x64xbf16> to vector<32x64xbf16>
    %c1_81 = arith.constant 1 : index
    %c0_82 = arith.constant 0 : index
    %c0_83 = arith.constant 0 : index
    %208 = vector.load %arg8[%c1_81, %c0_82, %c0_83] : memref<2x64x32xbf16, #tpu.memory_space<vmem>>, vector<1x64x32xbf16>
    %209 = vector.shape_cast %208 : vector<1x64x32xbf16> to vector<64x32xbf16>
    %c1_84 = arith.constant 1 : index
    %c0_85 = arith.constant 0 : index
    %c0_86 = arith.constant 0 : index
    %210 = vector.load %arg9[%c1_84, %c0_85, %c0_86] : memref<2x16x128xf32, #tpu.memory_space<vmem>>, vector<1x16x128xf32>
    %211 = vector.shape_cast %210 : vector<1x16x128xf32> to vector<16x128xf32>
    %212 = vector.extract_strided_slice %211 {offsets = [0, 0], sizes = [1, 32], strides = [1, 1]} : vector<16x128xf32> to vector<1x32xf32>
    %213 = vector.extract_strided_slice %211 {offsets = [1, 0], sizes = [1, 32], strides = [1, 1]} : vector<16x128xf32> to vector<1x32xf32>
    %214 = vector.extract_strided_slice %211 {offsets = [2, 0], sizes = [1, 32], strides = [1, 1]} : vector<16x128xf32> to vector<1x32xf32>
    %215 = vector.extract_strided_slice %211 {offsets = [3, 0], sizes = [1, 32], strides = [1, 1]} : vector<16x128xf32> to vector<1x32xf32>
    %216 = vector.extract_strided_slice %211 {offsets = [4, 0], sizes = [1, 32], strides = [1, 1]} : vector<16x128xf32> to vector<1x32xf32>
    %217 = vector.extract_strided_slice %211 {offsets = [5, 0], sizes = [1, 32], strides = [1, 1]} : vector<16x128xf32> to vector<1x32xf32>
    %218 = vector.extract_strided_slice %211 {offsets = [6, 0], sizes = [1, 64], strides = [1, 1]} : vector<16x128xf32> to vector<1x64xf32>
    %219 = vector.extract_strided_slice %211 {offsets = [7, 0], sizes = [1, 32], strides = [1, 1]} : vector<16x128xf32> to vector<1x32xf32>
    %220 = vector.extract_strided_slice %211 {offsets = [8, 0], sizes = [1, 32], strides = [1, 1]} : vector<16x128xf32> to vector<1x32xf32>
    %221 = vector.extract_strided_slice %211 {offsets = [9, 0], sizes = [1, 32], strides = [1, 1]} : vector<16x128xf32> to vector<1x32xf32>
    %222 = arith.truncf %197 : vector<16x32xf32> to vector<16x32xbf16>
    %cst_87 = arith.constant dense<0.000000e+00> : vector<16x32xf32>
    %223 = tpu.matmul %222, %199, %cst_87 {dimension_numbers = #tpu.dot_dimension_numbers<[1], [0], [0], [1], [0, 0, 1, 1], [], []>} : vector<16x32xbf16>, vector<32x32xbf16>, vector<16x32xf32> -> vector<16x32xf32>
    %224 = vector.broadcast %212 : vector<1x32xf32> to vector<16x32xf32>
    %225 = arith.addf %223, %224 : vector<16x32xf32>
    %226 = arith.truncf %197 : vector<16x32xf32> to vector<16x32xbf16>
    %cst_88 = arith.constant dense<0.000000e+00> : vector<16x32xf32>
    %227 = tpu.matmul %226, %201, %cst_88 {dimension_numbers = #tpu.dot_dimension_numbers<[1], [0], [0], [1], [0, 0, 1, 1], [], []>} : vector<16x32xbf16>, vector<32x32xbf16>, vector<16x32xf32> -> vector<16x32xf32>
    %228 = vector.broadcast %213 : vector<1x32xf32> to vector<16x32xf32>
    %229 = arith.addf %227, %228 : vector<16x32xf32>
    %230 = arith.truncf %197 : vector<16x32xf32> to vector<16x32xbf16>
    %cst_89 = arith.constant dense<0.000000e+00> : vector<16x32xf32>
    %231 = tpu.matmul %230, %203, %cst_89 {dimension_numbers = #tpu.dot_dimension_numbers<[1], [0], [0], [1], [0, 0, 1, 1], [], []>} : vector<16x32xbf16>, vector<32x32xbf16>, vector<16x32xf32> -> vector<16x32xf32>
    %232 = vector.broadcast %214 : vector<1x32xf32> to vector<16x32xf32>
    %233 = arith.addf %231, %232 : vector<16x32xf32>
    %cst_90 = arith.constant 2.500000e-01 : f32
    %234 = vector.broadcast %cst_90 : f32 to vector<16x32xf32>
    %235 = arith.mulf %225, %234 : vector<16x32xf32>
    %236 = vector.shape_cast %235 : vector<16x32xf32> to vector<2x8x32xf32>
    %237 = vector.shape_cast %229 : vector<16x32xf32> to vector<2x8x32xf32>
    %238 = vector.shape_cast %233 : vector<16x32xf32> to vector<2x8x32xf32>
    %239 = vector.extract_strided_slice %236 {offsets = [0, 0, 0], sizes = [2, 8, 16], strides = [1, 1, 1]} : vector<2x8x32xf32> to vector<2x8x16xf32>
    %240 = vector.extract_strided_slice %237 {offsets = [0, 0, 0], sizes = [2, 8, 16], strides = [1, 1, 1]} : vector<2x8x32xf32> to vector<2x8x16xf32>
    %241 = vector.extract_strided_slice %238 {offsets = [0, 0, 0], sizes = [2, 8, 16], strides = [1, 1, 1]} : vector<2x8x32xf32> to vector<2x8x16xf32>
    %242 = arith.truncf %239 : vector<2x8x16xf32> to vector<2x8x16xbf16>
    %243 = arith.truncf %240 : vector<2x8x16xf32> to vector<2x8x16xbf16>
    "tpu.trace_start"() <{level = 10 : i32, message = "bqd,bkd->bqk"}> : () -> ()
    %cst_91 = arith.constant dense<0.000000e+00> : vector<2x8x8xf32>
    %244 = tpu.matmul %242, %243, %cst_91 {dimension_numbers = #tpu.dot_dimension_numbers<[2], [2], [1], [1], [0, 0, 0, 1, 1, 1], [0], [0]>} : vector<2x8x16xbf16>, vector<2x8x16xbf16>, vector<2x8x8xf32> -> vector<2x8x8xf32>
    "tpu.trace_stop"() : () -> ()
    %245 = arith.addf %244, %34 : vector<2x8x8xf32>
    %cst_92 = arith.constant dense<0xFF800000> : vector<2x8xf32>
    %246 = vector.multi_reduction <maximumf>, %245, %cst_92 [2] : vector<2x8x8xf32> to vector<2x8xf32>
    %247 = vector.shape_cast %246 : vector<2x8xf32> to vector<2x8x1xf32>
    %248 = vector.broadcast %247 : vector<2x8x1xf32> to vector<2x8x8xf32>
    %249 = arith.subf %245, %248 : vector<2x8x8xf32>
    %250 = math.exp %249 : vector<2x8x8xf32>
    %cst_93 = arith.constant dense<0.000000e+00> : vector<2x8xf32>
    %251 = vector.multi_reduction <add>, %250, %cst_93 [2] : vector<2x8x8xf32> to vector<2x8xf32>
    %252 = vector.shape_cast %251 : vector<2x8xf32> to vector<2x8x1xf32>
    %253 = tpu.reciprocal %252 {approx = true} : vector<2x8x1xf32> -> vector<2x8x1xf32>
    %254 = vector.broadcast %253 : vector<2x8x1xf32> to vector<2x8x8xf32>
    %255 = arith.mulf %250, %254 : vector<2x8x8xf32>
    %256 = arith.truncf %255 : vector<2x8x8xf32> to vector<2x8x8xbf16>
    %257 = arith.truncf %241 : vector<2x8x16xf32> to vector<2x8x16xbf16>
    "tpu.trace_start"() <{level = 10 : i32, message = "bqk,bkd->bqd"}> : () -> ()
    %cst_94 = arith.constant dense<0.000000e+00> : vector<2x8x16xf32>
    %258 = tpu.matmul %256, %257, %cst_94 {dimension_numbers = #tpu.dot_dimension_numbers<[2], [1], [1], [2], [0, 0, 0, 1, 1, 2], [0], [0]>} : vector<2x8x8xbf16>, vector<2x8x16xbf16>, vector<2x8x16xf32> -> vector<2x8x16xf32>
    "tpu.trace_stop"() : () -> ()
    %259 = vector.shape_cast %258 : vector<2x8x16xf32> to vector<16x16xf32>
    %260 = vector.extract_strided_slice %205 {offsets = [0, 0], sizes = [16, 32], strides = [1, 1]} : vector<32x32xbf16> to vector<16x32xbf16>
    %261 = arith.truncf %259 : vector<16x16xf32> to vector<16x16xbf16>
    %cst_95 = arith.constant dense<0.000000e+00> : vector<16x32xf32>
    %262 = tpu.matmul %261, %260, %cst_95 {dimension_numbers = #tpu.dot_dimension_numbers<[1], [0], [0], [1], [0, 0, 1, 1], [], []>} : vector<16x16xbf16>, vector<16x32xbf16>, vector<16x32xf32> -> vector<16x32xf32>
    %263 = vector.extract_strided_slice %236 {offsets = [0, 0, 16], sizes = [2, 8, 16], strides = [1, 1, 1]} : vector<2x8x32xf32> to vector<2x8x16xf32>
    %264 = vector.extract_strided_slice %237 {offsets = [0, 0, 16], sizes = [2, 8, 16], strides = [1, 1, 1]} : vector<2x8x32xf32> to vector<2x8x16xf32>
    %265 = vector.extract_strided_slice %238 {offsets = [0, 0, 16], sizes = [2, 8, 16], strides = [1, 1, 1]} : vector<2x8x32xf32> to vector<2x8x16xf32>
    %266 = arith.truncf %263 : vector<2x8x16xf32> to vector<2x8x16xbf16>
    %267 = arith.truncf %264 : vector<2x8x16xf32> to vector<2x8x16xbf16>
    "tpu.trace_start"() <{level = 10 : i32, message = "bqd,bkd->bqk"}> : () -> ()
    %cst_96 = arith.constant dense<0.000000e+00> : vector<2x8x8xf32>
    %268 = tpu.matmul %266, %267, %cst_96 {dimension_numbers = #tpu.dot_dimension_numbers<[2], [2], [1], [1], [0, 0, 0, 1, 1, 1], [0], [0]>} : vector<2x8x16xbf16>, vector<2x8x16xbf16>, vector<2x8x8xf32> -> vector<2x8x8xf32>
    "tpu.trace_stop"() : () -> ()
    %269 = arith.addf %268, %34 : vector<2x8x8xf32>
    %cst_97 = arith.constant dense<0xFF800000> : vector<2x8xf32>
    %270 = vector.multi_reduction <maximumf>, %269, %cst_97 [2] : vector<2x8x8xf32> to vector<2x8xf32>
    %271 = vector.shape_cast %270 : vector<2x8xf32> to vector<2x8x1xf32>
    %272 = vector.broadcast %271 : vector<2x8x1xf32> to vector<2x8x8xf32>
    %273 = arith.subf %269, %272 : vector<2x8x8xf32>
    %274 = math.exp %273 : vector<2x8x8xf32>
    %cst_98 = arith.constant dense<0.000000e+00> : vector<2x8xf32>
    %275 = vector.multi_reduction <add>, %274, %cst_98 [2] : vector<2x8x8xf32> to vector<2x8xf32>
    %276 = vector.shape_cast %275 : vector<2x8xf32> to vector<2x8x1xf32>
    %277 = tpu.reciprocal %276 {approx = true} : vector<2x8x1xf32> -> vector<2x8x1xf32>
    %278 = vector.broadcast %277 : vector<2x8x1xf32> to vector<2x8x8xf32>
    %279 = arith.mulf %274, %278 : vector<2x8x8xf32>
    %280 = arith.truncf %279 : vector<2x8x8xf32> to vector<2x8x8xbf16>
    %281 = arith.truncf %265 : vector<2x8x16xf32> to vector<2x8x16xbf16>
    "tpu.trace_start"() <{level = 10 : i32, message = "bqk,bkd->bqd"}> : () -> ()
    %cst_99 = arith.constant dense<0.000000e+00> : vector<2x8x16xf32>
    %282 = tpu.matmul %280, %281, %cst_99 {dimension_numbers = #tpu.dot_dimension_numbers<[2], [1], [1], [2], [0, 0, 0, 1, 1, 2], [0], [0]>} : vector<2x8x8xbf16>, vector<2x8x16xbf16>, vector<2x8x16xf32> -> vector<2x8x16xf32>
    "tpu.trace_stop"() : () -> ()
    %283 = vector.shape_cast %282 : vector<2x8x16xf32> to vector<16x16xf32>
    %284 = vector.extract_strided_slice %205 {offsets = [16, 0], sizes = [16, 32], strides = [1, 1]} : vector<32x32xbf16> to vector<16x32xbf16>
    %285 = arith.truncf %283 : vector<16x16xf32> to vector<16x16xbf16>
    %cst_100 = arith.constant dense<0.000000e+00> : vector<16x32xf32>
    %286 = tpu.matmul %285, %284, %cst_100 {dimension_numbers = #tpu.dot_dimension_numbers<[1], [0], [0], [1], [0, 0, 1, 1], [], []>} : vector<16x16xbf16>, vector<16x32xbf16>, vector<16x32xf32> -> vector<16x32xf32>
    %287 = arith.addf %262, %286 : vector<16x32xf32>
    %288 = vector.broadcast %215 : vector<1x32xf32> to vector<16x32xf32>
    %289 = arith.addf %287, %288 : vector<16x32xf32>
    %290 = arith.addf %197, %289 : vector<16x32xf32>
    %cst_101 = arith.constant dense<0.000000e+00> : vector<16xf32>
    %291 = vector.multi_reduction <add>, %290, %cst_101 [1] : vector<16x32xf32> to vector<16xf32>
    %292 = vector.shape_cast %291 : vector<16xf32> to vector<16x1xf32>
    %cst_102 = arith.constant 3.200000e+01 : f32
    %293 = vector.broadcast %cst_102 : f32 to vector<16x1xf32>
    %294 = arith.divf %292, %293 : vector<16x1xf32>
    %295 = arith.mulf %290, %290 : vector<16x32xf32>
    %cst_103 = arith.constant dense<0.000000e+00> : vector<16xf32>
    %296 = vector.multi_reduction <add>, %295, %cst_103 [1] : vector<16x32xf32> to vector<16xf32>
    %297 = vector.shape_cast %296 : vector<16xf32> to vector<16x1xf32>
    %cst_104 = arith.constant 3.200000e+01 : f32
    %298 = vector.broadcast %cst_104 : f32 to vector<16x1xf32>
    %299 = arith.divf %297, %298 : vector<16x1xf32>
    %300 = arith.mulf %294, %294 : vector<16x1xf32>
    %301 = arith.subf %299, %300 : vector<16x1xf32>
    %cst_105 = arith.constant 0.000000e+00 : f32
    %302 = vector.broadcast %cst_105 : f32 to vector<16x1xf32>
    %303 = arith.maximumf %301, %302 : vector<16x1xf32>
    %304 = vector.broadcast %294 : vector<16x1xf32> to vector<16x32xf32>
    %305 = arith.subf %290, %304 : vector<16x32xf32>
    %cst_106 = arith.constant 9.99999996E-13 : f32
    %306 = vector.broadcast %cst_106 : f32 to vector<16x1xf32>
    %307 = arith.addf %303, %306 : vector<16x1xf32>
    %308 = math.rsqrt %307 : vector<16x1xf32>
    %309 = vector.broadcast %308 : vector<16x1xf32> to vector<16x32xf32>
    %310 = arith.mulf %305, %309 : vector<16x32xf32>
    %311 = vector.broadcast %216 : vector<1x32xf32> to vector<16x32xf32>
    %312 = arith.mulf %310, %311 : vector<16x32xf32>
    %313 = vector.broadcast %217 : vector<1x32xf32> to vector<16x32xf32>
    %314 = arith.addf %312, %313 : vector<16x32xf32>
    %315 = arith.truncf %314 : vector<16x32xf32> to vector<16x32xbf16>
    %cst_107 = arith.constant dense<0.000000e+00> : vector<16x64xf32>
    %316 = tpu.matmul %315, %207, %cst_107 {dimension_numbers = #tpu.dot_dimension_numbers<[1], [0], [0], [1], [0, 0, 1, 1], [], []>} : vector<16x32xbf16>, vector<32x64xbf16>, vector<16x64xf32> -> vector<16x64xf32>
    %317 = vector.broadcast %218 : vector<1x64xf32> to vector<16x64xf32>
    %318 = arith.addf %316, %317 : vector<16x64xf32>
    %319 = arith.mulf %318, %318 : vector<16x64xf32>
    %320 = arith.mulf %318, %319 : vector<16x64xf32>
    %cst_108 = arith.constant 4.471500e-02 : f32
    %321 = vector.broadcast %cst_108 : f32 to vector<16x64xf32>
    %322 = arith.mulf %321, %320 : vector<16x64xf32>
    %323 = arith.addf %318, %322 : vector<16x64xf32>
    %cst_109 = arith.constant 0.797884583 : f32
    %324 = vector.broadcast %cst_109 : f32 to vector<16x64xf32>
    %325 = arith.mulf %324, %323 : vector<16x64xf32>
    %326 = math.tanh %325 : vector<16x64xf32>
    %cst_110 = arith.constant 1.000000e+00 : f32
    %327 = vector.broadcast %cst_110 : f32 to vector<16x64xf32>
    %328 = arith.addf %327, %326 : vector<16x64xf32>
    %cst_111 = arith.constant 5.000000e-01 : f32
    %329 = vector.broadcast %cst_111 : f32 to vector<16x64xf32>
    %330 = arith.mulf %329, %328 : vector<16x64xf32>
    %331 = arith.mulf %318, %330 : vector<16x64xf32>
    %332 = arith.truncf %331 : vector<16x64xf32> to vector<16x64xbf16>
    %cst_112 = arith.constant dense<0.000000e+00> : vector<16x32xf32>
    %333 = tpu.matmul %332, %209, %cst_112 {dimension_numbers = #tpu.dot_dimension_numbers<[1], [0], [0], [1], [0, 0, 1, 1], [], []>} : vector<16x64xbf16>, vector<64x32xbf16>, vector<16x32xf32> -> vector<16x32xf32>
    %334 = vector.broadcast %219 : vector<1x32xf32> to vector<16x32xf32>
    %335 = arith.addf %333, %334 : vector<16x32xf32>
    %336 = arith.addf %314, %335 : vector<16x32xf32>
    %cst_113 = arith.constant dense<0.000000e+00> : vector<16xf32>
    %337 = vector.multi_reduction <add>, %336, %cst_113 [1] : vector<16x32xf32> to vector<16xf32>
    %338 = vector.shape_cast %337 : vector<16xf32> to vector<16x1xf32>
    %cst_114 = arith.constant 3.200000e+01 : f32
    %339 = vector.broadcast %cst_114 : f32 to vector<16x1xf32>
    %340 = arith.divf %338, %339 : vector<16x1xf32>
    %341 = arith.mulf %336, %336 : vector<16x32xf32>
    %cst_115 = arith.constant dense<0.000000e+00> : vector<16xf32>
    %342 = vector.multi_reduction <add>, %341, %cst_115 [1] : vector<16x32xf32> to vector<16xf32>
    %343 = vector.shape_cast %342 : vector<16xf32> to vector<16x1xf32>
    %cst_116 = arith.constant 3.200000e+01 : f32
    %344 = vector.broadcast %cst_116 : f32 to vector<16x1xf32>
    %345 = arith.divf %343, %344 : vector<16x1xf32>
    %346 = arith.mulf %340, %340 : vector<16x1xf32>
    %347 = arith.subf %345, %346 : vector<16x1xf32>
    %cst_117 = arith.constant 0.000000e+00 : f32
    %348 = vector.broadcast %cst_117 : f32 to vector<16x1xf32>
    %349 = arith.maximumf %347, %348 : vector<16x1xf32>
    %350 = vector.broadcast %340 : vector<16x1xf32> to vector<16x32xf32>
    %351 = arith.subf %336, %350 : vector<16x32xf32>
    %cst_118 = arith.constant 9.99999996E-13 : f32
    %352 = vector.broadcast %cst_118 : f32 to vector<16x1xf32>
    %353 = arith.addf %349, %352 : vector<16x1xf32>
    %354 = math.rsqrt %353 : vector<16x1xf32>
    %355 = vector.broadcast %354 : vector<16x1xf32> to vector<16x32xf32>
    %356 = arith.mulf %351, %355 : vector<16x32xf32>
    %357 = vector.broadcast %220 : vector<1x32xf32> to vector<16x32xf32>
    %358 = arith.mulf %356, %357 : vector<16x32xf32>
    %359 = vector.broadcast %221 : vector<1x32xf32> to vector<16x32xf32>
    %360 = arith.addf %358, %359 : vector<16x32xf32>
    %361 = vector.shape_cast %360 : vector<16x32xf32> to vector<2x8x32xf32>
    %362 = vector.shape_cast %27 : vector<2x8xf32> to vector<2x8x1xf32>
    %363 = vector.broadcast %362 : vector<2x8x1xf32> to vector<2x8x32xf32>
    %364 = arith.mulf %361, %363 : vector<2x8x32xf32>
    %cst_119 = arith.constant dense<0.000000e+00> : vector<2x32xf32>
    %365 = vector.multi_reduction <add>, %364, %cst_119 [1] : vector<2x8x32xf32> to vector<2x32xf32>
    %cst_120 = arith.constant dense<0.000000e+00> : vector<2xf32>
    %366 = vector.multi_reduction <add>, %27, %cst_120 [1] : vector<2x8xf32> to vector<2xf32>
    %367 = vector.shape_cast %366 : vector<2xf32> to vector<2x1xf32>
    %cst_121 = arith.constant 9.99999971E-10 : f32
    %368 = vector.broadcast %cst_121 : f32 to vector<2x1xf32>
    %369 = arith.maximumf %367, %368 : vector<2x1xf32>
    %370 = vector.broadcast %369 : vector<2x1xf32> to vector<2x32xf32>
    %371 = arith.divf %365, %370 : vector<2x32xf32>
    %cst_122 = arith.constant 0.000000e+00 : f32
    %372 = vector.broadcast %cst_122 : f32 to vector<2x96xf32>
    %373 = tpu.concatenate %371, %372 in 1 : vector<2x32xf32>, vector<2x96xf32> -> vector<2x128xf32>
    %c0_123 = arith.constant 0 : index
    %c0_124 = arith.constant 0 : index
    %374 = vector.load %arg10[%c0_123, %c0_124] : memref<2x128xf32, #tpu.memory_space<vmem>>, vector<2x128xf32>
    tpu.vector_store %arg10[%c0_123, %c0_124], %373 {strides = array<i32>} : memref<2x128xf32, #tpu.memory_space<vmem>>, vector<2x128xf32>,
    return
  }
}

</mosaic_0001>

<bundles_post_ra>
// kernel: text_encoder_forward.1
= control target key start
LH: loop header
LB: loop body
LE: loop exit
PB: predicated region body
PF: predicated region fallthrough
CT: control target
= control target key end

     0   :  { %vm41_vm0 = vcmask 261120   ;;  %s2146_s0 = inlined_call_operand.vmem [shape: f32[16,32], index: 0, kind: input, shape index: {}]   ;;  %s2147_s1 = inlined_call_operand.vmem [shape: f32[2,8], index: 1, kind: input, shape index: {}]   ;;  %s2148_s2 = inlined_call_operand.vmem [shape: f32[2,32], index: 2, kind: input, shape index: {}]   ;;  %s2149_s3 = inlined_call_operand.vmem [shape: bf16[2,32,32], index: 3, kind: input, shape index: {}]   ;;  %s2150_s4 = inlined_call_operand.vmem [shape: bf16[2,32,32], index: 4, kind: input, shape index: {}]   ;;  %s2151_s5 = inlined_call_operand.vmem [shape: bf16[2,32,32], index: 5, kind: input, shape index: {}]   ;;  %s2152_s6 = inlined_call_operand.vmem [shape: bf16[2,32,32], index: 6, kind: input, shape index: {}]   ;;  %s2153_s7 = inlined_call_operand.vmem [shape: bf16[2,32,64], index: 7, kind: input, shape index: {}]   ;;  %s2154_s8 = inlined_call_operand.vmem [shape: bf16[2,64,32], index: 8, kind: input, shape index: {}]   ;;  %s2155_s9 = inlined_call_operand.vmem [shape: f32[2,16,128], index: 9, kind: input, shape index: {}]   ;;  %s2156_s10 = inlined_call_operand.hbm [shape: f32[2,128], index: 10, kind: output, shape index: {}]  }
   0x1   :  { %v1803_v0 = vld [vmem:[%s2146_s0] sm:$0xff] }
   0x2   :  { %v42_v1 = vsel %vm41_vm0, %v1803_v0, 0.0  ;;  %v57_v2 = vmul.f32 %v1803_v0, %v1803_v0 }
   0x3   :  { %15 = vsyncpa [#allocation3], 0  ;;  %43 = vadd.xlane.f32.xlu0 %v42_v1  ;;  %v1812_v3 = vld [vmem:[%s2146_s0 + $0x8] sm:$0xff]  ;;  %v1742_v8 = vmov 32.0   ;;  %v1614_v24 = vld [vmem:[%s2149_s3] sm:$0xff]  ;;  %vm235_vm8 = vcmask 130048  }
   0x4   :  { %v59_v4 = vsel %vm41_vm0, %v57_v2, 0.0  ;;  %v58_v5 = vmul.f32 %v1812_v3, %v1812_v3  ;;  %v45_v6 = vsel %vm41_vm0, %v1812_v3, 0.0  ;;  %1649 = vrcp.f32 %v1742_v8  ;;  %v1615_v20 = vld [vmem:[%s2149_s3 + $0x8] sm:$0xff]  ;;  %v1616_v25 = vld [vmem:[%s2150_s4] sm:$0xff]  ;;  %s1433_s20 = sshll.u32 %s2156_s10, 4  ;;  %s1434_s20 = int_to_ptr.hbm [resolvable:$true] %s1433_s20 }
   0x5   :  { %60 = vadd.xlane.f32.xlu1 %v59_v4  ;;  %v1617_v21 = vld [vmem:[%s2150_s4 + $0x8] sm:$0xff]  ;;  %167 = vmatpush.bf16.msra.mxu0 %v1615_v20  ;;  %v1618_v26 = vld [vmem:[%s2151_s5] sm:$0xff]  ;;  %vm304_vm9 = vcmask 1043456   ;;  %vm274_vm10 = vcmask 64512  }
   0x6   :  { %v62_v7 = vsel %vm41_vm0, %v58_v5, 0.0  ;;  %v1619_v22 = vld [vmem:[%s2151_s5 + $0x8] sm:$0xff]  ;;  %194 = vmatpush.bf16.msra.mxu1 %v1617_v21  ;;  %v1647_v51 = vld [vmem:[%s2148_s2] ss:$0 sm:$0xff]  ;;  %v1648_v57 = vld [vmem:[%s2148_s2 + $0x1] ss:$0 sm:$0xff] }
   0x7   :  { %221 = vmatpush.bf16.msra.mxu2 %v1619_v22  ;;  %v1864_v62 = vld [vmem:[%s2155_s9] sm:$0xff]  ;;  %s1743_s2 = smov 112  }
   0x8   :  { %v145_v63 = vperm.slane %v1864_v62, 0 }
   0x9   :  { %168 = vmatpush.bf16.msra.mxu0 %v1614_v24 }
   0xa   :  { %v1650_v9 = vpop.eup %1649  ;;  %195 = vmatpush.bf16.msra.mxu1 %v1616_v25 }
   0xb   :  { %46 = vadd.xlane.f32.xlu0 %v45_v6  ;;  %v49_v10 = vmul.f32 32.0, %v1650_v9  ;;  %vm53_vm1 = vweird.f32 %v1650_v9  ;;  %222 = vmatpush.bf16.msra.mxu2 %v1618_v26 }
   0xd   :  { %63 = vadd.xlane.f32.xlu1 %v62_v7  ;;  %v50_v11 = vsub.f32 1.0, %v49_v10  ;;  %v202_v7 = vperm.slane %v1864_v62, 2 }
   0xf   :  { %v51_v12 = vmul.f32 %v1650_v9, %v50_v11 }
  0x11   :  { %v52_v13 = vadd.f32 %v1650_v9, %v51_v12 }
  0x13   :  { %v1820_v14 = vsel %vm53_vm1, %v1650_v9, %v52_v13 }
  0x76   :  { %v44_v15 = vpop.xlane.xlu0 %43 }
  0x77   :  { %v55_v16 = vmul.f32 %v1820_v14, %v44_v15 }
  0x78   :  { %v61_v17 = vpop.xlane.xlu1 %60 }
  0x79   :  { %v67_v18 = vmul.f32 %v55_v16, %v55_v16  ;;  %v65_v19 = vmul.f32 %v61_v17, %v1820_v14  ;;  %v73_v48 = vsub.f32 %v1803_v0, %v55_v16  ;;  %v175_v0 = vperm.slane %v1864_v62, 1 }
  0x7b   :  { %v69_v23 = vsub.f32 %v65_v19, %v67_v18 }
  0x7d   :  { %v71_v27 = vmax.f32 %v69_v23, 0.0 }
  0x7e   :  { %v47_v28 = vpop.xlane.xlu0 %46 }
  0x7f   :  { %v75_v29 = vadd.f32 1e-12, %v71_v27  ;;  %v56_v30 = vmul.f32 %v1820_v14, %v47_v28 }
  0x80   :  { %v64_v31 = vpop.xlane.xlu1 %63 }
  0x81   :  { %1651 = vrsqrt.f32 %v75_v29  ;;  %v68_v32 = vmul.f32 %v56_v30, %v56_v30  ;;  %v66_v33 = vmul.f32 %v64_v31, %v1820_v14  ;;  %vm83_vm3 = vweird.f32 %v75_v29 }
  0x82   :  { %v74_v53 = vsub.f32 %v1812_v3, %v56_v30 }
  0x83   :  { %v70_v34 = vsub.f32 %v66_v33, %v68_v32 }
  0x85   :  { %v72_v35 = vmax.f32 %v70_v34, 0.0 }
  0x87   :  { %v1652_v36 = vpop.eup %1651  ;;  %v76_v38 = vadd.f32 1e-12, %v72_v35 }
  0x88   :  { %v78_v37 = vmul.f32 %v1652_v36, %v75_v29  ;;  %vm84_vm2 = vweird.f32 %v1652_v36 }
  0x89   :  { %1653 = vrsqrt.f32 %v76_v38  ;;  %vm85_vm4 = vmor %vm83_vm3, %vm84_vm2  ;;  %vm93_vm6 = vweird.f32 %v76_v38  ;;  %vm654_vm2 = vcmask 523264  }
  0x8a   :  { %v79_v39 = vmul.f32 %v1652_v36, %v78_v37 }
  0x8c   :  { %v80_v40 = vmul.f32 0.5, %v79_v39 }
  0x8e   :  { %v81_v41 = vsub.f32 1.5, %v80_v40  ;;  %v105_v40 = vld [vmem:[%s2147_s1] sm:$0x3] }
  0x8f   :  { %v1654_v42 = vpop.eup %1653 }
  0x90   :  { %v82_v43 = vmul.f32 %v1652_v36, %v81_v41  ;;  %v88_v44 = vmul.f32 %v1654_v42, %v76_v38  ;;  %vm94_vm5 = vweird.f32 %v1654_v42  ;;  %v106_v41 = vsub.f32 1.0, %v105_v40 }
  0x91   :  { %vm95_vm7 = vmor %vm93_vm6, %vm94_vm5 }
  0x92   :  { %v89_v45 = vmul.f32 %v1654_v42, %v88_v44  ;;  %v86_v47 = vsel %vm85_vm4, %v1652_v36, %v82_v43  ;;  %v107_v43 = vmul.f32 -1e+09, %v106_v41 }
  0x93   :  { %v97_v50 = vmul.f32 %v86_v47, %v73_v48 }
  0x94   :  { %v90_v46 = vmul.f32 0.5, %v89_v45  ;;  %v109_v44 = vrot.slane %v107_v43, 1  ;;  %v1889_v45 = vperm.slane %v107_v43, 0 }
  0x95   :  { %v100_v56 = vmul.f32 %v1647_v51, %v97_v50 }
  0x96   :  { %v91_v49 = vsub.f32 1.5, %v90_v46  ;;  %v1891_v46 = vperm.slane %v109_v44, 0 }
  0x97   :  { %v1852_v59 = vadd.f32 %v1648_v57, %v100_v56 }
  0x98   :  { %v92_v52 = vmul.f32 %v1654_v42, %v91_v49 }
  0x9a   :  { %v96_v54 = vsel %vm95_vm7, %v1654_v42, %v92_v52 }
  0x9b   :  { %v98_v55 = vmul.f32 %v96_v54, %v74_v53 }
  0x9d   :  { %v101_v58 = vmul.f32 %v1647_v51, %v98_v55 }
  0x9f   :  { %v1854_v60 = vadd.f32 %v1648_v57, %v101_v58 }
  0xa1   :  { %v144_v61 = vpack.c.bf16 %v1854_v60, %v1852_v59 }
  0xa3   :  { %1450 = vmatmul.msk.bf16.vlgmr.msra.gmra.mxu0 %vm41_vm0, %v144_v61  ;;  %1459 = vmatmul.msk.bf16.vlgmr.msra.gmra.mxu1 %vm41_vm0, %v144_v61 }
  0xa4   :  { %1468 = vmatmul.msk.bf16.vlgmr.msra.gmra.mxu2 %vm41_vm0, %v144_v61 }
 0x120   :  { %v170_v1 = vpop.f32.mrf.mxu0  ;;  %v197_v2 = vpop.f32.mrf.mxu1 }
 0x121   :  { %v171_v3 = vadd.f32 %v170_v1, %v145_v63  ;;  %v198_v4 = vadd.f32 %v197_v2, %v175_v0 }
 0x123   :  { %v229_v5 = vmul.f32 0.25, %v171_v3  ;;  %v233_v6 = vpack.c.bf16 %v198_v4, %v198_v4 }
 0x125   :  { %v231_v8 = vpack.c.bf16 %v229_v5, %v229_v5  ;;  %v240_v9 = vsel %vm235_vm8, %v233_v6, 0  ;;  %v347_v10 = vunpack.c.l.b16 %v233_v6 }
 0x126   :  { %249 = vmatpush.bf16.xpose.msra.mxu3 %v240_v9 }
 0x127   :  { %v342_v11 = vunpack.c.l.b16 %v231_v8  ;;  %v224_v12 = vpop.f32.mrf.mxu2  ;;  %v348_v13 = vpack.c.b16 %v347_v10, %v347_v10 }
 0x128   :  { %v225_v15 = vadd.f32 %v224_v12, %v202_v7  ;;  %v172_v16 = vpop.f32.mrf.mxu0  ;;  %v199_v17 = vpop.f32.mrf.mxu1 }
 0x129   :  { %v173_v18 = vadd.f32 %v172_v16, %v145_v63  ;;  %v200_v19 = vadd.f32 %v199_v17, %v175_v0  ;;  %349 = vrot.lane.b32.xlu2 %v348_v13, %s1743_s2  ;;  %v343_v20 = vpack.c.b16 %v342_v11, %v342_v11 }
 0x12a   :  { %v1871_v21 = vpack.c.bf16 %v225_v15, %v225_v15 }
 0x12b   :  { %v230_v22 = vmul.f32 0.25, %v173_v18  ;;  %v234_v23 = vpack.c.bf16 %v200_v19, %v200_v19  ;;  %344 = vrot.lane.b32.xlu0 %v343_v20, %s1743_s2 }
 0x12c   :  { %v306_v24 = vsel %vm304_vm9, %v1871_v21, 0 }
 0x12d   :  { %v232_v25 = vpack.c.bf16 %v230_v22, %v230_v22  ;;  %v376_v26 = vunpack.c.l.b16 %v234_v23  ;;  %315 = vmatpush.bf16.msrb.mxu1 %v306_v24  ;;  %1469 = vmatmul.msk.bf16.vlgmr.msra.gmra.mxu3 %vm235_vm8, %v231_v8  ;;  %v259_v27 = vsel %vm235_vm8, %v234_v23, 0 }
 0x12e   :  { %268 = vmatpush.bf16.xpose.msrb.mxu0 %v259_v27 }
 0x12f   :  { %v371_v28 = vunpack.c.l.b16 %v232_v25  ;;  %v377_v29 = vpack.c.b16 %v376_v26, %v376_v26  ;;  %v226_v30 = vpop.f32.mrf.mxu2 }
 0x130   :  { %v227_v31 = vadd.f32 %v226_v30, %v202_v7 }
 0x131   :  { %378 = vrot.lane.b32.xlu2 %v377_v29, %s1743_s2  ;;  %v372_v32 = vpack.c.b16 %v371_v28, %v371_v28 }
 0x132   :  { %v300_v33 = vpack.c.bf16 %v227_v31, %v227_v31 }
 0x133   :  { %373 = vrot.lane.b32.xlu1 %v372_v32, %s1743_s2 }
 0x134   :  { %v325_v34 = vsel %vm304_vm9, %v300_v33, 0  ;;  %v448_v11 = vunpack.c.l.b16 %v300_v33  ;;  %v424_v33 = vunpack.c.l.b16 %v1871_v21 }
 0x135   :  { %334 = vmatpush.bf16.msrb.mxu2 %v325_v34  ;;  %1470 = vmatmul.msk.bf16.vlgmr.msrb.gmra.mxu0 %vm235_vm8, %v232_v25 }
 0x136   :  { %v449_v13 = vpack.c.b16 %v448_v11, %v448_v11 }
 0x183   :  { %v350_v35 = vpop.permute.xlu2 %349 }
 0x184   :  { %v355_v36 = vsel %vm235_vm8, %v350_v35, 0  ;;  %v425_v35 = vpack.c.b16 %v424_v33, %v424_v33 }
 0x185   :  { %364 = vmatpush.bf16.xpose.msrb.mxu3 %v355_v36 }
 0x18b   :  { %v379_v37 = vpop.permute.xlu2 %378 }
 0x18c   :  { %v384_v38 = vsel %vm235_vm8, %v379_v37, 0 }
 0x18d   :  { %393 = vmatpush.bf16.xpose.msra.mxu0 %v384_v38  ;;  %v1620_v38 = vld [vmem:[%s2152_s6] sm:$0xff] }
 0x195   :  { %511 = vmatpush.bf16.msrb.mxu0 %v1620_v38 }
 0x19d   :  { %v345_v39 = vpop.permute.xlu0 %344 }
 0x19e   :  { %1473 = vmatmul.msk.bf16.vlgmr.msrb.gmra.mxu3 %vm235_vm8, %v345_v39 }
 0x1a5   :  { %v374_v42 = vpop.permute.xlu1 %373 }
 0x1a6   :  { %1474 = vmatmul.msk.bf16.vlgmr.msra.gmra.mxu0 %vm235_vm8, %v374_v42 }
 0x1b0   :  { %v251_v47 = vpop.f32.mrf.mxu3 }
 0x1b1   :  { %v252_v48 = vadd.f32 %v251_v47, %v1889_v45 }
 0x1b2   :  { %v270_v49 = vpop.f32.mrf.mxu0 }
 0x1b3   :  { %v271_v50 = vadd.f32 %v270_v49, %v1891_v46  ;;  %v275_v51 = vsel %vm274_vm10, %v252_v48, -inf }
 0x1b4   :  { %276 = vmax.xlane.f32.xlu0 %v275_v51 }
 0x1b5   :  { %v278_v52 = vsel %vm274_vm10, %v271_v50, -inf }
 0x1b6   :  { %279 = vmax.xlane.f32.xlu2 %v278_v52 }
 0x1b8   :  { %v253_v53 = vpop.f32.mrf.mxu3 }
 0x1ba   :  { %v272_v54 = vpop.f32.mrf.mxu0 }
 0x221   :  { %v366_v55 = vpop.f32.mrf.mxu3 }
 0x222   :  { %v367_v56 = vadd.f32 %v366_v55, %v1889_v45  ;;  %v1621_v55 = vld [vmem:[%s2152_s6 + $0x8] sm:$0xff] }
 0x223   :  { %v395_v57 = vpop.f32.mrf.mxu0  ;;  %488 = vmatpush.bf16.msra.mxu3 %v1621_v55 }
 0x224   :  { %v396_v58 = vadd.f32 %v395_v57, %v1891_v46  ;;  %v399_v61 = vsel %vm274_vm10, %v367_v56, -inf }
 0x225   :  { %400 = vmax.xlane.f32.xlu2 %v399_v61 }
 0x226   :  { %v402_v63 = vsel %vm274_vm10, %v396_v58, -inf }
 0x227   :  { %403 = vmax.xlane.f32.xlu1 %v402_v63  ;;  %v277_v0 = vpop.xlane.xlu0 %276 }
 0x228   :  { %v281_v5 = vsub.f32 %v252_v48, %v277_v0 }
 0x229   :  { %v280_v1 = vpop.xlane.xlu2 %279  ;;  %v368_v2 = vpop.f32.mrf.mxu3 }
 0x22a   :  { %v282_v3 = vsub.f32 %v271_v50, %v280_v1  ;;  %v283_v7 = vmul.f32 1.442695, %v281_v5  ;;  %v518_v1 = vperm.slane %v1864_v62, 3 }
 0x22b   :  { %v397_v4 = vpop.f32.mrf.mxu0 }
 0x22c   :  { %v285_v6 = vmul.f32 1.442695, %v282_v3 }
 0x22e   :  { %1655 = vpow2.f32 %v285_v6 }
 0x22f   :  { %1657 = vpow2.f32 %v283_v7 }
 0x234   :  { %v1656_v8 = vpop.eup %1655 }
 0x235   :  { %v290_v9 = vsel %vm274_vm10, %v1656_v8, 0.0  ;;  %v1658_v10 = vpop.eup %1657 }
 0x236   :  { %291 = vadd.xlane.f32.xlu2 %v290_v9  ;;  %v287_v12 = vsel %vm274_vm10, %v1658_v10, 0.0 }
 0x23e   :  { %288 = vadd.xlane.f32.xlu2 %v287_v12 }
 0x240   :  { %450 = vrot.lane.b32.xlu1 %v449_v13, %s1743_s2 }
 0x298   :  { %v401_v15 = vpop.xlane.xlu2 %400 }
 0x299   :  { %v405_v16 = vsub.f32 %v367_v56, %v401_v15 }
 0x29a   :  { %v404_v17 = vpop.xlane.xlu1 %403 }
 0x29b   :  { %v407_v18 = vmul.f32 1.442695, %v405_v16  ;;  %v406_v19 = vsub.f32 %v396_v58, %v404_v17 }
 0x29d   :  { %1659 = vpow2.f32 %v407_v18  ;;  %v409_v20 = vmul.f32 1.442695, %v406_v19 }
 0x29f   :  { %1661 = vpow2.f32 %v409_v20 }
 0x2a3   :  { %v1660_v22 = vpop.eup %1659 }
 0x2a4   :  { %v411_v23 = vsel %vm274_vm10, %v1660_v22, 0.0 }
 0x2a5   :  { %v1662_v24 = vpop.eup %1661  ;;  %412 = vadd.xlane.f32.xlu2 %v411_v23  ;;  %v1623_v23 = vld [vmem:[%s2153_s7 + $0x8] sm:$0xff] }
 0x2a6   :  { %v414_v25 = vsel %vm274_vm10, %v1662_v24, 0.0 }
 0x2a7   :  { %415 = vadd.xlane.f32.xlu0 %v414_v25 }
 0x2a9   :  { %v292_v26 = vpop.xlane.xlu2 %291 }
 0x2aa   :  { %1663 = vrcp.f32 %v292_v26  ;;  %v1622_v26 = vld [vmem:[%s2153_s7] sm:$0xff] }
 0x2b0   :  { %v1664_v27 = vpop.eup %1663 }
 0x2b1   :  { %v296_v28 = vmul.f32 %v1664_v27, %v1656_v8  ;;  %v289_v29 = vpop.xlane.xlu2 %288 }
 0x2b2   :  { %1665 = vrcp.f32 %v289_v29  ;;  %v451_v30 = vpop.permute.xlu1 %450 }
 0x2b3   :  { %v456_v31 = vsel %vm304_vm9, %v451_v30, 0  ;;  %v298_v32 = vpack.c.bf16 %v296_v28, %v296_v28 }
 0x2b4   :  { %465 = vmatpush.bf16.msra.mxu2 %v456_v31 }
 0x2b5   :  { %1472 = vmatmul.msk.bf16.vlgmr.msrb.gmra.mxu2 %vm274_vm10, %v298_v32 }
 0x2b8   :  { %v1666_v34 = vpop.eup %1665 }
 0x2b9   :  { %v295_v36 = vmul.f32 %v1666_v34, %v1658_v10 }
 0x2bb   :  { %426 = vrot.lane.b32.xlu0 %v425_v35, %s1743_s2  ;;  %v297_v37 = vpack.c.bf16 %v295_v36, %v295_v36 }
 0x2bd   :  { %1471 = vmatmul.msk.bf16.vlgmr.msrb.gmra.mxu1 %vm274_vm10, %v297_v37 }
 0x318   :  { %v413_v40 = vpop.xlane.xlu2 %412 }
 0x31a   :  { %v416_v39 = vpop.xlane.xlu0 %415 }
 0x31b   :  { %1667 = vrcp.f32 %v416_v39 }
 0x31c   :  { %1669 = vrcp.f32 %v413_v40 }
 0x321   :  { %v1668_v41 = vpop.eup %1667 }
 0x322   :  { %v420_v21 = vmul.f32 %v1668_v41, %v1662_v24  ;;  %v1670_v43 = vpop.eup %1669 }
 0x323   :  { %v419_v44 = vmul.f32 %v1670_v43, %v1660_v22 }
 0x324   :  { %v422_v42 = vpack.c.bf16 %v420_v21, %v420_v21 }
 0x325   :  { %v421_v49 = vpack.c.bf16 %v419_v44, %v419_v44 }
 0x326   :  { %1476 = vmatmul.msk.bf16.vlgmr.msra.gmra.mxu2 %vm274_vm10, %v422_v42 }
 0x32d   :  { %v427_v47 = vpop.permute.xlu0 %426 }
 0x32e   :  { %v432_v48 = vsel %vm304_vm9, %v427_v47, 0 }
 0x32f   :  { %441 = vmatpush.bf16.msra.mxu1 %v432_v48 }
 0x332   :  { %1475 = vmatmul.msk.bf16.vlgmr.msra.gmra.mxu1 %vm274_vm10, %v421_v49  ;;  %v573_v49 = vperm.slane %v1864_v62, 4 }
 0x333   :  { %602 = vmatpush.bf16.msrb.mxu1 %v1623_v23 }
 0x337   :  { %603 = vmatpush.bf16.msrb.mxu1 %v1622_v26 }
 0x338   :  { %v336_v50 = vpop.f32.mrf.mxu2 }
 0x33a   :  { %v317_v51 = vpop.f32.mrf.mxu1 }
 0x33b   :  { %v340_v52 = vpack.c.bf16 %v336_v50, %v317_v51 }
 0x33d   :  { %1486 = vmatmul.msk.bf16.vlgmr.msrb.gmra.mxu0 %vm235_vm8, %v340_v52 }
 0x340   :  { %v338_v53 = vpop.f32.mrf.mxu2 }
 0x342   :  { %v319_v54 = vpop.f32.mrf.mxu1 }
 0x3a9   :  { %v467_v56 = vpop.f32.mrf.mxu2 }
 0x3af   :  { %v443_v57 = vpop.f32.mrf.mxu1 }
 0x3b0   :  { %v471_v58 = vpack.c.bf16 %v467_v56, %v443_v57  ;;  %v576_v56 = vperm.slane %v1864_v62, 5 }
 0x3b1   :  { %v469_v61 = vpop.f32.mrf.mxu2 }
 0x3b2   :  { %1481 = vmatmul.msk.bf16.vlgmr.msra.gmra.mxu3 %vm235_vm8, %v471_v58 }
 0x3b7   :  { %v445_v63 = vpop.f32.mrf.mxu1 }
 0x3ba   :  { %v513_v0 = vpop.f32.mrf.mxu0 }
 0x3c2   :  { %v515_v7 = vpop.f32.mrf.mxu0 }
 0x435   :  { %v490_v2 = vpop.f32.mrf.mxu3 }
 0x436   :  { %v514_v3 = vadd.f32 %v513_v0, %v490_v2  ;;  %v1627_v0 = vld [vmem:[%s2154_s8 + $0x18] sm:$0xff]  ;;  %v1625_v2 = vld [vmem:[%s2154_s8 + $0x8] sm:$0xff] }
 0x437   :  { %662 = vmatpush.bf16.msrb.mxu2 %v1627_v0 }
 0x438   :  { %v519_v4 = vadd.f32 %v518_v1, %v514_v3  ;;  %v580_v3 = vperm.slane %v1864_v62, 6 }
 0x43a   :  { %v1924_v5 = vadd.f32 %v519_v4, %v1852_v59 }
 0x43c   :  { %v523_v6 = vsel %vm41_vm0, %v1924_v5, 0.0  ;;  %v531_v59 = vmul.f32 %v1924_v5, %v1924_v5 }
 0x43d   :  { %524 = vadd.xlane.f32.xlu2 %v523_v6  ;;  %v492_v8 = vpop.f32.mrf.mxu3 }
 0x43e   :  { %v516_v9 = vadd.f32 %v515_v7, %v492_v8  ;;  %v533_v16 = vsel %vm41_vm0, %v531_v59, 0.0 }
 0x440   :  { %v520_v10 = vadd.f32 %v518_v1, %v516_v9  ;;  %v1626_v1 = vld [vmem:[%s2154_s8 + $0x10] sm:$0xff] }
 0x441   :  { %663 = vmatpush.bf16.msrb.mxu2 %v1626_v1 }
 0x442   :  { %v522_v11 = vadd.f32 %v520_v10, %v1854_v60 }
 0x444   :  { %v526_v12 = vsel %vm41_vm0, %v522_v11, 0.0  ;;  %v532_v13 = vmul.f32 %v522_v11, %v522_v11 }
 0x445   :  { %527 = vadd.xlane.f32.xlu2 %v526_v12  ;;  %664 = vmatpush.bf16.msrb.mxu2 %v1625_v2 }
 0x446   :  { %v536_v15 = vsel %vm41_vm0, %v532_v13, 0.0 }
 0x447   :  { %537 = vadd.xlane.f32.xlu0 %v536_v15 }
 0x44d   :  { %534 = vadd.xlane.f32.xlu2 %v533_v16 }
 0x4b0   :  { %v525_v17 = vpop.xlane.xlu2 %524 }
 0x4b1   :  { %v529_v24 = vmul.f32 %v525_v17, %v1820_v14 }
 0x4b3   :  { %v541_v29 = vmul.f32 %v529_v24, %v529_v24  ;;  %v547_v52 = vsub.f32 %v1924_v5, %v529_v24  ;;  %v1624_v5 = vld [vmem:[%s2154_s8] sm:$0xff] }
 0x4b4   :  { %665 = vmatpush.bf16.msrb.mxu2 %v1624_v5 }
 0x4b8   :  { %v528_v18 = vpop.xlane.xlu2 %527 }
 0x4b9   :  { %v530_v19 = vmul.f32 %v528_v18, %v1820_v14 }
 0x4ba   :  { %v538_v20 = vpop.xlane.xlu0 %537 }
 0x4bb   :  { %v542_v22 = vmul.f32 %v530_v19, %v530_v19  ;;  %v540_v60 = vmul.f32 %v538_v20, %v1820_v14  ;;  %v548_v47 = vsub.f32 %v522_v11, %v530_v19 }
 0x4bd   :  { %v544_v25 = vsub.f32 %v540_v60, %v542_v22 }
 0x4bf   :  { %v546_v27 = vmax.f32 %v544_v25, 0.0 }
 0x4c0   :  { %v535_v28 = vpop.xlane.xlu2 %534 }
 0x4c1   :  { %v550_v30 = vadd.f32 1e-12, %v546_v27  ;;  %v539_v31 = vmul.f32 %v535_v28, %v1820_v14  ;;  %v629_v28 = vperm.slane %v1864_v62, 7 }
 0x4c3   :  { %1671 = vrsqrt.f32 %v550_v30  ;;  %v543_v32 = vsub.f32 %v539_v31, %v541_v29  ;;  %vm567_vm12 = vweird.f32 %v550_v30 }
 0x4c5   :  { %v545_v33 = vmax.f32 %v543_v32, 0.0 }
 0x4c7   :  { %v549_v34 = vadd.f32 1e-12, %v545_v33 }
 0x4c9   :  { %v1672_v35 = vpop.eup %1671  ;;  %1673 = vrsqrt.f32 %v549_v34  ;;  %vm557_vm15 = vweird.f32 %v549_v34 }
 0x4ca   :  { %v562_v36 = vmul.f32 %v1672_v35, %v550_v30  ;;  %vm568_vm11 = vweird.f32 %v1672_v35 }
 0x4cb   :  { %vm569_vm13 = vmor %vm567_vm12, %vm568_vm11 }
 0x4cc   :  { %v563_v37 = vmul.f32 %v1672_v35, %v562_v36 }
 0x4ce   :  { %v564_v38 = vmul.f32 0.5, %v563_v37 }
 0x4cf   :  { %v1674_v39 = vpop.eup %1673 }
 0x4d0   :  { %v565_v40 = vsub.f32 1.5, %v564_v38  ;;  %v552_v41 = vmul.f32 %v1674_v39, %v549_v34  ;;  %vm558_vm14 = vweird.f32 %v1674_v39 }
 0x4d1   :  { %vm559_vm1 = vmor %vm557_vm15, %vm558_vm14  ;;  %vm1379_vm15 = vcmask 58368  }
 0x4d2   :  { %v566_v21 = vmul.f32 %v1672_v35, %v565_v40  ;;  %v553_v42 = vmul.f32 %v1674_v39, %v552_v41 }
 0x4d4   :  { %v570_v43 = vsel %vm569_vm13, %v1672_v35, %v566_v21  ;;  %v554_v44 = vmul.f32 0.5, %v553_v42 }
 0x4d5   :  { %v572_v50 = vmul.f32 %v570_v43, %v548_v47 }
 0x4d6   :  { %v555_v48 = vsub.f32 1.5, %v554_v44 }
 0x4d7   :  { %v575_v54 = vmul.f32 %v573_v49, %v572_v50  ;;  %v1629_v50 = vld [vmem:[%s2149_s3 + $0x18] sm:$0xff] }
 0x4d8   :  { %v556_v51 = vmul.f32 %v1674_v39, %v555_v48  ;;  %790 = vmatpush.bf16.msrb.mxu3 %v1629_v50 }
 0x4d9   :  { %v578_v61 = vadd.f32 %v576_v56, %v575_v54  ;;  %v1628_v54 = vld [vmem:[%s2149_s3 + $0x10] sm:$0xff] }
 0x4da   :  { %v560_v53 = vsel %vm559_vm1, %v1674_v39, %v556_v51  ;;  %v1631_v51 = vld [vmem:[%s2150_s4 + $0x18] sm:$0xff] }
 0x4db   :  { %v571_v55 = vmul.f32 %v560_v53, %v547_v52  ;;  %v1633_v52 = vld [vmem:[%s2151_s5 + $0x18] sm:$0xff]  ;;  %817 = vmatpush.bf16.msra.mxu0 %v1631_v51 }
 0x4dc   :  { %844 = vmatpush.bf16.msra.mxu1 %v1633_v52  ;;  %791 = vmatpush.bf16.msrb.mxu3 %v1628_v54 }
 0x4dd   :  { %v574_v57 = vmul.f32 %v573_v49, %v571_v55  ;;  %v1630_v55 = vld [vmem:[%s2150_s4 + $0x10] sm:$0xff] }
 0x4df   :  { %v577_v58 = vadd.f32 %v576_v56, %v574_v57  ;;  %v1632_v56 = vld [vmem:[%s2151_s5 + $0x10] sm:$0xff]  ;;  %818 = vmatpush.bf16.msra.mxu0 %v1630_v55 }
 0x4e0   :  { %845 = vmatpush.bf16.msra.mxu1 %v1632_v56 }
 0x4e1   :  { %v579_v63 = vpack.c.bf16 %v578_v61, %v577_v58 }
 0x4e3   :  { %1495 = vmatmul.msk.bf16.vlgmr.msrb.gmra.mxu1 %vm41_vm0, %v579_v63 }
 0x560   :  { %v605_v4 = vpop.f32.mrf.mxu1 }
 0x561   :  { %v606_v6 = vadd.f32 %v605_v4, %v580_v3 }
 0x563   :  { %v610_v7 = vmul.f32 %v606_v6, %v606_v6 }
 0x565   :  { %v612_v8 = vmul.f32 %v610_v7, %v606_v6 }
 0x567   :  { %v614_v9 = vmul.f32 0.044715, %v612_v8 }
 0x568   :  { %v607_v10 = vpop.f32.mrf.mxu1 }
 0x569   :  { %v616_v11 = vadd.f32 %v614_v9, %v606_v6  ;;  %v608_v12 = vadd.f32 %v607_v10, %v580_v3 }
 0x56b   :  { %v618_v13 = vmul.f32 0.7978846, %v616_v11  ;;  %v611_v15 = vmul.f32 %v608_v12, %v608_v12  ;;  %v143_v11 = vld [vmem:[%s2155_s9 + $0x8] sm:$0xff] }
 0x56d   :  { %v613_v59 = vmul.f32 %v611_v15, %v608_v12  ;;  %1675 = vtanh.f32 %v618_v13 }
 0x56f   :  { %v615_v16 = vmul.f32 0.044715, %v613_v59 }
 0x571   :  { %v617_v17 = vadd.f32 %v615_v16, %v608_v12  ;;  %v724_v16 = vperm.slane %v143_v11, 0 }
 0x573   :  { %v619_v18 = vmul.f32 0.7978846, %v617_v17  ;;  %v1676_v19 = vpop.eup %1675 }
 0x574   :  { %v622_v20 = vadd.f32 1.0, %v1676_v19 }
 0x575   :  { %1677 = vtanh.f32 %v619_v18 }
 0x576   :  { %v624_v60 = vmul.f32 0.5, %v622_v20 }
 0x578   :  { %v626_v25 = vmul.f32 %v624_v60, %v606_v6 }
 0x57b   :  { %v1678_v22 = vpop.eup %1677 }
 0x57c   :  { %v623_v23 = vadd.f32 1.0, %v1678_v22 }
 0x57e   :  { %v625_v24 = vmul.f32 0.5, %v623_v23  ;;  %v727_v23 = vperm.slane %v143_v11, 1 }
 0x580   :  { %v627_v26 = vmul.f32 %v625_v24, %v608_v12 }
 0x582   :  { %v628_v27 = vpack.c.bf16 %v627_v26, %v626_v25 }
 0x584   :  { %1512 = vmatmul.msk.bf16.vlgmr.msrb.gmra.mxu2 %vm654_vm2, %v628_v27 }
 0x607   :  { %v667_v29 = vpop.f32.mrf.mxu2 }
 0x608   :  { %v668_v30 = vadd.f32 %v667_v29, %v629_v28 }
 0x60a   :  { %v1963_v31 = vadd.f32 %v668_v30, %v577_v58 }
 0x60c   :  { %v674_v32 = vsel %vm41_vm0, %v1963_v31, 0.0  ;;  %v682_v33 = vmul.f32 %v1963_v31, %v1963_v31 }
 0x60d   :  { %675 = vadd.xlane.f32.xlu1 %v674_v32 }
 0x60e   :  { %v684_v34 = vsel %vm41_vm0, %v682_v33, 0.0 }
 0x60f   :  { %v669_v35 = vpop.f32.mrf.mxu2  ;;  %685 = vadd.xlane.f32.xlu2 %v684_v34 }
 0x610   :  { %v670_v36 = vadd.f32 %v669_v35, %v629_v28  ;;  %v2016_v28 = vld [vmem:[%s2155_s9 + $0x10] sm:$0xff] }
 0x611   :  { %v798_v29 = vperm.slane %v2016_v28, 1  ;;  %v825_v30 = vperm.slane %v2016_v28, 2 }
 0x612   :  { %v1970_v37 = vadd.f32 %v670_v36, %v578_v61  ;;  %v768_v36 = vperm.slane %v2016_v28, 0 }
 0x614   :  { %v677_v62 = vsel %vm41_vm0, %v1970_v37, 0.0  ;;  %v683_v38 = vmul.f32 %v1970_v37, %v1970_v37 }
 0x616   :  { %v687_v39 = vsel %vm41_vm0, %v683_v38, 0.0 }
 0x617   :  { %678 = vadd.xlane.f32.xlu2 %v677_v62 }
 0x61f   :  { %688 = vadd.xlane.f32.xlu2 %v687_v39 }
 0x680   :  { %v676_v40 = vpop.xlane.xlu1 %675 }
 0x681   :  { %v680_v41 = vmul.f32 %v676_v40, %v1820_v14 }
 0x682   :  { %v686_v21 = vpop.xlane.xlu2 %685 }
 0x683   :  { %v692_v42 = vmul.f32 %v680_v41, %v680_v41  ;;  %v690_v43 = vmul.f32 %v686_v21, %v1820_v14  ;;  %v698_v15 = vsub.f32 %v1963_v31, %v680_v41 }
 0x685   :  { %v694_v44 = vsub.f32 %v690_v43, %v692_v42 }
 0x687   :  { %v696_v47 = vmax.f32 %v694_v44, 0.0 }
 0x689   :  { %v700_v48 = vadd.f32 1e-12, %v696_v47 }
 0x68a   :  { %v679_v49 = vpop.xlane.xlu2 %678 }
 0x68b   :  { %1679 = vrsqrt.f32 %v700_v48  ;;  %v681_v53 = vmul.f32 %v679_v49, %v1820_v14  ;;  %vm708_vm4 = vweird.f32 %v700_v48 }
 0x68d   :  { %v693_v63 = vmul.f32 %v681_v53, %v681_v53  ;;  %v699_v19 = vsub.f32 %v1970_v37, %v681_v53 }
 0x691   :  { %v1680_v57 = vpop.eup %1679 }
 0x692   :  { %v703_v58 = vmul.f32 %v1680_v57, %v700_v48  ;;  %v689_v61 = vpop.xlane.xlu2 %688  ;;  %vm709_vm3 = vweird.f32 %v1680_v57 }
 0x693   :  { %v691_v0 = vmul.f32 %v689_v61, %v1820_v14  ;;  %vm710_vm5 = vmor %vm708_vm4, %vm709_vm3 }
 0x694   :  { %v704_v2 = vmul.f32 %v1680_v57, %v703_v58 }
 0x695   :  { %v695_v1 = vsub.f32 %v691_v0, %v693_v63 }
 0x696   :  { %v705_v5 = vmul.f32 0.5, %v704_v2 }
 0x697   :  { %v697_v3 = vmax.f32 %v695_v1, 0.0 }
 0x698   :  { %v706_v6 = vsub.f32 1.5, %v705_v5 }
 0x699   :  { %v701_v4 = vadd.f32 1e-12, %v697_v3 }
 0x69a   :  { %v707_v8 = vmul.f32 %v1680_v57, %v706_v6 }
 0x69b   :  { %1681 = vrsqrt.f32 %v701_v4  ;;  %vm718_vm7 = vweird.f32 %v701_v4 }
 0x69c   :  { %v711_v12 = vsel %vm710_vm5, %v1680_v57, %v707_v8 }
 0x69d   :  { %v722_v17 = vmul.f32 %v711_v12, %v698_v15 }
 0x69f   :  { %v725_v22 = vmul.f32 %v724_v16, %v722_v17 }
 0x6a1   :  { %v1682_v7 = vpop.eup %1681  ;;  %v2004_v25 = vadd.f32 %v727_v23, %v725_v22 }
 0x6a2   :  { %v713_v9 = vmul.f32 %v1682_v7, %v701_v4  ;;  %vm719_vm6 = vweird.f32 %v1682_v7 }
 0x6a3   :  { %vm720_vm11 = vmor %vm718_vm7, %vm719_vm6 }
 0x6a4   :  { %v714_v10 = vmul.f32 %v1682_v7, %v713_v9 }
 0x6a6   :  { %v715_v13 = vmul.f32 0.5, %v714_v10 }
 0x6a8   :  { %v716_v59 = vsub.f32 1.5, %v715_v13 }
 0x6aa   :  { %v717_v18 = vmul.f32 %v1682_v7, %v716_v59 }
 0x6ac   :  { %v721_v20 = vsel %vm720_vm11, %v1682_v7, %v717_v18 }
 0x6ad   :  { %v723_v60 = vmul.f32 %v721_v20, %v699_v19 }
 0x6af   :  { %v726_v24 = vmul.f32 %v724_v16, %v723_v60 }
 0x6b1   :  { %v2006_v26 = vadd.f32 %v727_v23, %v726_v24 }
 0x6b3   :  { %v767_v27 = vpack.c.bf16 %v2006_v26, %v2004_v25 }
 0x6b5   :  { %1551 = vmatmul.msk.bf16.vlgmr.msrb.gmra.mxu3 %vm41_vm0, %v767_v27  ;;  %1560 = vmatmul.msk.bf16.vlgmr.msra.gmra.mxu0 %vm41_vm0, %v767_v27 }
 0x6b6   :  { %1569 = vmatmul.msk.bf16.vlgmr.msra.gmra.mxu1 %vm41_vm0, %v767_v27 }
 0x732   :  { %v820_v31 = vpop.f32.mrf.mxu0 }
 0x733   :  { %v821_v32 = vadd.f32 %v820_v31, %v798_v29  ;;  %v847_v33 = vpop.f32.mrf.mxu1 }
 0x734   :  { %v848_v34 = vadd.f32 %v847_v33, %v825_v30 }
 0x735   :  { %v856_v35 = vpack.c.bf16 %v821_v32, %v821_v32 }
 0x736   :  { %v2021_v37 = vpack.c.bf16 %v848_v34, %v848_v34 }
 0x737   :  { %v862_v62 = vsel %vm235_vm8, %v856_v35, 0  ;;  %v967_v38 = vunpack.c.l.b16 %v856_v35 }
 0x738   :  { %v926_v39 = vsel %vm304_vm9, %v2021_v37, 0  ;;  %v793_v40 = vpop.f32.mrf.mxu3  ;;  %871 = vmatpush.bf16.xpose.msra.mxu2 %v862_v62  ;;  %v1044_v62 = vunpack.c.l.b16 %v2021_v37 }
 0x739   :  { %v968_v41 = vpack.c.b16 %v967_v38, %v967_v38  ;;  %v794_v21 = vadd.f32 %v793_v40, %v768_v36  ;;  %935 = vmatpush.bf16.msrb.mxu0 %v926_v39 }
 0x73a   :  { %v822_v42 = vpop.f32.mrf.mxu0  ;;  %v1045_v38 = vpack.c.b16 %v1044_v62, %v1044_v62 }
 0x73b   :  { %v852_v43 = vmul.f32 0.25, %v794_v21  ;;  %v823_v44 = vadd.f32 %v822_v42, %v798_v29  ;;  %v849_v47 = vpop.f32.mrf.mxu1  ;;  %969 = vrot.lane.b32.xlu2 %v968_v41, %s1743_s2 }
 0x73c   :  { %v850_v48 = vadd.f32 %v849_v47, %v825_v30 }
 0x73d   :  { %v854_v49 = vpack.c.bf16 %v852_v43, %v852_v43  ;;  %v857_v50 = vpack.c.bf16 %v823_v44, %v823_v44 }
 0x73e   :  { %v2027_v51 = vpack.c.bf16 %v850_v48, %v850_v48 }
 0x73f   :  { %v962_v52 = vunpack.c.l.b16 %v854_v49  ;;  %v881_v53 = vsel %vm235_vm8, %v857_v50, 0  ;;  %v996_v54 = vunpack.c.l.b16 %v857_v50  ;;  %1570 = vmatmul.msk.bf16.vlgmr.msra.gmra.mxu2 %vm235_vm8, %v854_v49 }
 0x740   :  { %v945_v55 = vsel %vm304_vm9, %v2027_v51, 0  ;;  %v795_v56 = vpop.f32.mrf.mxu3  ;;  %890 = vmatpush.bf16.xpose.msra.mxu3 %v881_v53 }
 0x741   :  { %v997_v57 = vpack.c.b16 %v996_v54, %v996_v54  ;;  %v796_v58 = vadd.f32 %v795_v56, %v768_v36  ;;  %954 = vmatpush.bf16.msrb.mxu1 %v945_v55  ;;  %v963_v61 = vpack.c.b16 %v962_v52, %v962_v52  ;;  %v1068_v56 = vunpack.c.l.b16 %v2027_v51 }
 0x743   :  { %v853_v63 = vmul.f32 0.25, %v796_v58  ;;  %998 = vrot.lane.b32.xlu0 %v997_v57, %s1743_s2  ;;  %964 = vrot.lane.b32.xlu1 %v963_v61, %s1743_s2  ;;  %v1069_v58 = vpack.c.b16 %v1068_v56, %v1068_v56 }
 0x745   :  { %v855_v0 = vpack.c.bf16 %v853_v63, %v853_v63 }
 0x747   :  { %v991_v1 = vunpack.c.l.b16 %v855_v0  ;;  %1571 = vmatmul.msk.bf16.vlgmr.msra.gmra.mxu3 %vm235_vm8, %v855_v0  ;;  %v1634_v0 = vld [vmem:[%s2152_s6 + $0x10] sm:$0xff] }
 0x749   :  { %v992_v2 = vpack.c.b16 %v991_v1, %v991_v1 }
 0x74b   :  { %993 = vrot.lane.b32.xlu2 %v992_v2, %s1743_s2 }
 0x795   :  { %v970_v3 = vpop.permute.xlu2 %969 }
 0x796   :  { %v975_v4 = vsel %vm235_vm8, %v970_v3, 0 }
 0x797   :  { %984 = vmatpush.bf16.xpose.msrb.mxu2 %v975_v4 }
 0x7a5   :  { %v994_v8 = vpop.permute.xlu2 %993 }
 0x7b5   :  { %v999_v5 = vpop.permute.xlu0 %998  ;;  %v965_v6 = vpop.permute.xlu1 %964 }
 0x7b6   :  { %v1004_v7 = vsel %vm235_vm8, %v999_v5, 0  ;;  %1574 = vmatmul.msk.bf16.vlgmr.msrb.gmra.mxu2 %vm235_vm8, %v965_v6 }
 0x7b7   :  { %1013 = vmatpush.bf16.xpose.msrb.mxu3 %v1004_v7 }
 0x7be   :  { %1575 = vmatmul.msk.bf16.vlgmr.msrb.gmra.mxu3 %vm235_vm8, %v994_v8 }
 0x7bf   :  { %1131 = vmatpush.bf16.msra.mxu3 %v1634_v0 }
 0x7c2   :  { %v873_v9 = vpop.f32.mrf.mxu2 }
 0x7c3   :  { %v874_v10 = vadd.f32 %v873_v9, %v1889_v45 }
 0x7c5   :  { %v896_v11 = vsel %vm274_vm10, %v874_v10, -inf }
 0x7c6   :  { %897 = vmax.xlane.f32.xlu0 %v896_v11 }
 0x7ca   :  { %v875_v12 = vpop.f32.mrf.mxu2  ;;  %v892_v13 = vpop.f32.mrf.mxu3 }
 0x7cb   :  { %v893_v15 = vadd.f32 %v892_v13, %v1891_v46 }
 0x7cd   :  { %v899_v59 = vsel %vm274_vm10, %v893_v15, -inf }
 0x7ce   :  { %900 = vmax.xlane.f32.xlu2 %v899_v59  ;;  %v1635_v59 = vld [vmem:[%s2152_s6 + $0x18] sm:$0xff] }
 0x7cf   :  { %1108 = vmatpush.bf16.msra.mxu2 %v1635_v59 }
 0x7d2   :  { %v894_v16 = vpop.f32.mrf.mxu3 }
 0x839   :  { %v986_v17 = vpop.f32.mrf.mxu2  ;;  %v898_v18 = vpop.xlane.xlu0 %897 }
 0x83a   :  { %v987_v19 = vadd.f32 %v986_v17, %v1889_v45  ;;  %v902_v20 = vsub.f32 %v874_v10, %v898_v18 }
 0x83c   :  { %v904_v22 = vmul.f32 1.442695, %v902_v20  ;;  %v1019_v60 = vsel %vm274_vm10, %v987_v19, -inf }
 0x83d   :  { %1020 = vmax.xlane.f32.xlu1 %v1019_v60  ;;  %v1138_v60 = vperm.slane %v2016_v28, 3 }
 0x83e   :  { %1683 = vpow2.f32 %v904_v22 }
 0x841   :  { %v1015_v23 = vpop.f32.mrf.mxu3  ;;  %v901_v24 = vpop.xlane.xlu2 %900 }
 0x842   :  { %v1016_v27 = vadd.f32 %v1015_v23, %v1891_v46  ;;  %v903_v29 = vsub.f32 %v893_v15, %v901_v24  ;;  %v988_v30 = vpop.f32.mrf.mxu2 }
 0x844   :  { %v1684_v31 = vpop.eup %1683  ;;  %v906_v32 = vmul.f32 1.442695, %v903_v29  ;;  %v1022_v33 = vsel %vm274_vm10, %v1016_v27, -inf }
 0x845   :  { %1023 = vmax.xlane.f32.xlu0 %v1022_v33  ;;  %v908_v34 = vsel %vm274_vm10, %v1684_v31, 0.0 }
 0x846   :  { %1685 = vpow2.f32 %v906_v32  ;;  %909 = vadd.xlane.f32.xlu2 %v908_v34 }
 0x849   :  { %v1017_v45 = vpop.f32.mrf.mxu3 }
 0x84c   :  { %v1686_v35 = vpop.eup %1685 }
 0x84d   :  { %v911_v36 = vsel %vm274_vm10, %v1686_v35, 0.0 }
 0x84e   :  { %912 = vadd.xlane.f32.xlu1 %v911_v36 }
 0x867   :  { %1046 = vrot.lane.b32.xlu1 %v1045_v38, %s1743_s2 }
 0x8b0   :  { %v1021_v46 = vpop.xlane.xlu1 %1020 }
 0x8b1   :  { %v1025_v39 = vsub.f32 %v987_v19, %v1021_v46 }
 0x8b3   :  { %v1027_v40 = vmul.f32 1.442695, %v1025_v39 }
 0x8b5   :  { %1687 = vpow2.f32 %v1027_v40 }
 0x8b8   :  { %v1024_v41 = vpop.xlane.xlu0 %1023 }
 0x8b9   :  { %v1026_v21 = vsub.f32 %v1016_v27, %v1024_v41  ;;  %v910_v42 = vpop.xlane.xlu2 %909 }
 0x8ba   :  { %1689 = vrcp.f32 %v910_v42  ;;  %v1637_v42 = vld [vmem:[%s2153_s7 + $0x18] sm:$0xff] }
 0x8bb   :  { %v1688_v43 = vpop.eup %1687  ;;  %v1029_v44 = vmul.f32 1.442695, %v1026_v21 }
 0x8bc   :  { %v1031_v47 = vsel %vm274_vm10, %v1688_v43, 0.0 }
 0x8bd   :  { %1691 = vpow2.f32 %v1029_v44  ;;  %1032 = vadd.xlane.f32.xlu0 %v1031_v47  ;;  %v1636_v47 = vld [vmem:[%s2153_s7 + $0x10] sm:$0xff] }
 0x8c0   :  { %v1690_v48 = vpop.eup %1689 }
 0x8c1   :  { %v916_v49 = vmul.f32 %v1690_v48, %v1684_v31  ;;  %v913_v37 = vpop.xlane.xlu1 %912 }
 0x8c2   :  { %1693 = vrcp.f32 %v913_v37 }
 0x8c3   :  { %v1692_v50 = vpop.eup %1691  ;;  %v918_v52 = vpack.c.bf16 %v916_v49, %v916_v49 }
 0x8c4   :  { %v1034_v53 = vsel %vm274_vm10, %v1692_v50, 0.0 }
 0x8c5   :  { %1572 = vmatmul.msk.bf16.vlgmr.msrb.gmra.mxu0 %vm274_vm10, %v918_v52  ;;  %1035 = vadd.xlane.f32.xlu2 %v1034_v53 }
 0x8c8   :  { %v1694_v54 = vpop.eup %1693 }
 0x8c9   :  { %v917_v55 = vmul.f32 %v1694_v54, %v1686_v35 }
 0x8cb   :  { %v919_v57 = vpack.c.bf16 %v917_v55, %v917_v55 }
 0x8cd   :  { %1573 = vmatmul.msk.bf16.vlgmr.msrb.gmra.mxu1 %vm274_vm10, %v919_v57 }
 0x8d1   :  { %1070 = vrot.lane.b32.xlu0 %v1069_v58, %s1743_s2 }
 0x8d9   :  { %v1047_v61 = vpop.permute.xlu1 %1046 }
 0x8da   :  { %v1052_v63 = vsel %vm304_vm9, %v1047_v61, 0 }
 0x8db   :  { %1061 = vmatpush.bf16.msra.mxu0 %v1052_v63 }
 0x8df   :  { %1222 = vmatpush.bf16.msrb.mxu0 %v1637_v42 }
 0x8e3   :  { %1223 = vmatpush.bf16.msrb.mxu0 %v1636_v47  ;;  %v1249_v47 = vperm.slane %v2016_v28, 7 }
 0x930   :  { %v1033_v1 = vpop.xlane.xlu0 %1032 }
 0x931   :  { %1695 = vrcp.f32 %v1033_v1 }
 0x937   :  { %v1696_v2 = vpop.eup %1695 }
 0x938   :  { %v1039_v3 = vmul.f32 %v1696_v2, %v1688_v43  ;;  %v1036_v51 = vpop.xlane.xlu2 %1035 }
 0x939   :  { %1697 = vrcp.f32 %v1036_v51 }
 0x93a   :  { %v1041_v4 = vpack.c.bf16 %v1039_v3, %v1039_v3 }
 0x93c   :  { %1576 = vmatmul.msk.bf16.vlgmr.msra.gmra.mxu0 %vm274_vm10, %v1041_v4 }
 0x93f   :  { %v1698_v5 = vpop.eup %1697 }
 0x940   :  { %v1040_v6 = vmul.f32 %v1698_v5, %v1692_v50 }
 0x942   :  { %v937_v7 = vpop.f32.mrf.mxu0  ;;  %v1042_v10 = vpack.c.bf16 %v1040_v6, %v1040_v6 }
 0x943   :  { %v1071_v8 = vpop.permute.xlu0 %1070 }
 0x944   :  { %v1076_v9 = vsel %vm304_vm9, %v1071_v8, 0 }
 0x945   :  { %1085 = vmatpush.bf16.msra.mxu1 %v1076_v9 }
 0x948   :  { %1577 = vmatmul.msk.bf16.vlgmr.msra.gmra.mxu1 %vm274_vm10, %v1042_v10 }
 0x94a   :  { %v939_v11 = vpop.f32.mrf.mxu0  ;;  %v956_v12 = vpop.f32.mrf.mxu1 }
 0x94b   :  { %v960_v13 = vpack.c.bf16 %v956_v12, %v937_v7  ;;  %v1193_v7 = vperm.slane %v2016_v28, 4 }
 0x94d   :  { %1587 = vmatmul.msk.bf16.vlgmr.msra.gmra.mxu3 %vm235_vm8, %v960_v13 }
 0x952   :  { %v958_v15 = vpop.f32.mrf.mxu1 }
 0x953   :  { %v1196_v15 = vperm.slane %v2016_v28, 5 }
 0x9b9   :  { %v1063_v16 = vpop.f32.mrf.mxu0 }
 0x9c1   :  { %v1065_v17 = vpop.f32.mrf.mxu0 }
 0x9c5   :  { %v1087_v18 = vpop.f32.mrf.mxu1 }
 0x9c6   :  { %v1091_v19 = vpack.c.bf16 %v1087_v18, %v1063_v16 }
 0x9c8   :  { %1582 = vmatmul.msk.bf16.vlgmr.msra.gmra.mxu2 %vm235_vm8, %v1091_v19  ;;  %v1641_v19 = vld [vmem:[%s2154_s8 + $0x38] sm:$0xff] }
 0x9c9   :  { %1281 = vmatpush.bf16.msrb.mxu1 %v1641_v19 }
 0x9cd   :  { %v1089_v20 = vpop.f32.mrf.mxu1 }
 0x9ce   :  { %v1640_v20 = vld [vmem:[%s2154_s8 + $0x30] sm:$0xff] }
 0x9cf   :  { %1282 = vmatpush.bf16.msrb.mxu1 %v1640_v20 }
 0x9d0   :  { %v1133_v22 = vpop.f32.mrf.mxu3 }
 0x9d8   :  { %v1135_v31 = vpop.f32.mrf.mxu3 }
 0xa4b   :  { %v1110_v23 = vpop.f32.mrf.mxu2 }
 0xa4c   :  { %v1134_v24 = vadd.f32 %v1133_v22, %v1110_v23  ;;  %v1639_v22 = vld [vmem:[%s2154_s8 + $0x28] sm:$0xff] }
 0xa4d   :  { %1283 = vmatpush.bf16.msrb.mxu1 %v1639_v22 }
 0xa4e   :  { %v1139_v27 = vadd.f32 %v1138_v60, %v1134_v24  ;;  %v1638_v24 = vld [vmem:[%s2154_s8 + $0x20] sm:$0xff] }
 0xa50   :  { %v2073_v29 = vadd.f32 %v1139_v27, %v2004_v25 }
 0xa51   :  { %1284 = vmatpush.bf16.msrb.mxu1 %v1638_v24  ;;  %v1542_v24 = vld [vmem:[%s2155_s9 + $0x18] sm:$0xff]  ;;  %s1744_s9 = smov [#allocation2]  }
 0xa52   :  { %v1143_v30 = vsel %vm41_vm0, %v2073_v29, 0.0  ;;  %v1151_v25 = vmul.f32 %v2073_v29, %v2073_v29  ;;  %s1431_s17 = sshll.u32 %s1744_s9, 4  ;;  %s1432_s17 = int_to_ptr.vmem [resolvable:$true] %s1431_s17 }
 0xa53   :  { %1144 = vadd.xlane.f32.xlu2 %v1143_v30  ;;  %v1112_v32 = vpop.f32.mrf.mxu2 }
 0xa54   :  { %v1136_v33 = vadd.f32 %v1135_v31, %v1112_v32  ;;  %v1153_v38 = vsel %vm41_vm0, %v1151_v25, 0.0 }
 0xa56   :  { %v1140_v34 = vadd.f32 %v1138_v60, %v1136_v33  ;;  %v1200_v60 = vperm.slane %v2016_v28, 6 }
 0xa58   :  { %v1142_v45 = vadd.f32 %v1140_v34, %v2006_v26 }
 0xa5a   :  { %v1146_v35 = vsel %vm41_vm0, %v1142_v45, 0.0  ;;  %v1152_v36 = vmul.f32 %v1142_v45, %v1142_v45 }
 0xa5b   :  { %1147 = vadd.xlane.f32.xlu2 %v1146_v35 }
 0xa5c   :  { %v1156_v62 = vsel %vm41_vm0, %v1152_v36, 0.0 }
 0xa5d   :  { %1157 = vadd.xlane.f32.xlu0 %v1156_v62 }
 0xa63   :  { %1154 = vadd.xlane.f32.xlu2 %v1153_v38 }
 0xac6   :  { %v1145_v46 = vpop.xlane.xlu2 %1144 }
 0xac7   :  { %v1149_v43 = vmul.f32 %v1145_v46, %v1820_v14 }
 0xac9   :  { %v1161_v37 = vmul.f32 %v1149_v43, %v1149_v43  ;;  %v1167_v10 = vsub.f32 %v2073_v29, %v1149_v43 }
 0xace   :  { %v1148_v39 = vpop.xlane.xlu2 %1147 }
 0xacf   :  { %v1150_v40 = vmul.f32 %v1148_v39, %v1820_v14 }
 0xad0   :  { %v1158_v41 = vpop.xlane.xlu0 %1157 }
 0xad1   :  { %v1162_v21 = vmul.f32 %v1150_v40, %v1150_v40  ;;  %v1160_v26 = vmul.f32 %v1158_v41, %v1820_v14  ;;  %v1168_v5 = vsub.f32 %v1142_v45, %v1150_v40 }
 0xad3   :  { %v1164_v44 = vsub.f32 %v1160_v26, %v1162_v21 }
 0xad5   :  { %v1166_v48 = vmax.f32 %v1164_v44, 0.0 }
 0xad6   :  { %v1155_v49 = vpop.xlane.xlu2 %1154 }
 0xad7   :  { %v1170_v50 = vadd.f32 1e-12, %v1166_v48  ;;  %v1159_v52 = vmul.f32 %v1155_v49, %v1820_v14  ;;  %v1350_v48 = vlaneseq }
 0xad9   :  { %1699 = vrsqrt.f32 %v1170_v50  ;;  %v1163_v53 = vsub.f32 %v1159_v52, %v1161_v37  ;;  %vm1187_vm9 = vweird.f32 %v1170_v50  ;;  %v1351_v37 = vshrl.u32 %v1350_v48, 7 }
 0xadb   :  { %v1165_v54 = vmax.f32 %v1163_v53, 0.0  ;;  %1646 = vset.pattern.permute.xlu0 %v1351_v37  ;;  %1645 = vset.pattern.permute.xlu2 %v1351_v37 }
 0xadd   :  { %v1169_v55 = vadd.f32 1e-12, %v1165_v54  ;;  %v1715_v54 = vld [vmem:[%s2147_s1] sm:$0x3] }
 0xadf   :  { %v1700_v56 = vpop.eup %1699  ;;  %1701 = vrsqrt.f32 %v1169_v55  ;;  %vm1177_vm13 = vweird.f32 %v1169_v55 }
 0xae0   :  { %v1182_v57 = vmul.f32 %v1700_v56, %v1170_v50  ;;  %vm1188_vm8 = vweird.f32 %v1700_v56 }
 0xae1   :  { %vm1189_vm10 = vmor %vm1187_vm9, %vm1188_vm8 }
 0xae2   :  { %v1183_v58 = vmul.f32 %v1700_v56, %v1182_v57 }
 0xae4   :  { %v1184_v61 = vmul.f32 0.5, %v1183_v58 }
 0xae5   :  { %v1702_v63 = vpop.eup %1701 }
 0xae6   :  { %v1185_v0 = vsub.f32 1.5, %v1184_v61  ;;  %v1172_v1 = vmul.f32 %v1702_v63, %v1169_v55  ;;  %vm1178_vm12 = vweird.f32 %v1702_v63  ;;  %v1349_v55 = vperm.slane %v1715_v54, 0 }
 0xae7   :  { %vm1179_vm14 = vmor %vm1177_vm13, %vm1178_vm12 }
 0xae8   :  { %v1186_v2 = vmul.f32 %v1700_v56, %v1185_v0  ;;  %v1173_v3 = vmul.f32 %v1702_v63, %v1172_v1  ;;  %1354 = vperm.xlu0 %1646, %v1349_v55   ;;  %v1380_v0 = vsel %vm1379_vm15, %v1715_v54, 0.0  ;;  %vm1421_vm15 = vcmask 1041409  }
 0xaea   :  { %v1190_v51 = vsel %vm1189_vm10, %v1700_v56, %v1186_v2  ;;  %v1174_v4 = vmul.f32 0.5, %v1173_v3  ;;  %v1356_v3 = vperm.slane %v1715_v54, 1 }
 0xaeb   :  { %v1192_v8 = vmul.f32 %v1190_v51, %v1168_v5 }
 0xaec   :  { %v1175_v6 = vsub.f32 1.5, %v1174_v4 }
 0xaed   :  { %v1195_v12 = vmul.f32 %v1193_v7, %v1192_v8 }
 0xaee   :  { %v1176_v9 = vmul.f32 %v1702_v63, %v1175_v6 }
 0xaef   :  { %v1198_v17 = vadd.f32 %v1196_v15, %v1195_v12 }
 0xaf0   :  { %v1180_v11 = vsel %vm1179_vm14, %v1702_v63, %v1176_v9 }
 0xaf1   :  { %v1191_v13 = vmul.f32 %v1180_v11, %v1167_v10 }
 0xaf3   :  { %v1194_v59 = vmul.f32 %v1193_v7, %v1191_v13 }
 0xaf5   :  { %v1197_v16 = vadd.f32 %v1196_v15, %v1194_v59 }
 0xaf7   :  { %v1199_v18 = vpack.c.bf16 %v1198_v17, %v1197_v16 }
 0xaf9   :  { %1596 = vmatmul.msk.bf16.vlgmr.msrb.gmra.mxu0 %vm41_vm0, %v1199_v18 }
 0xb76   :  { %v1225_v23 = vpop.f32.mrf.mxu0 }
 0xb77   :  { %v1226_v27 = vadd.f32 %v1225_v23, %v1200_v60 }
 0xb79   :  { %v1230_v29 = vmul.f32 %v1226_v27, %v1226_v27 }
 0xb7b   :  { %v1232_v30 = vmul.f32 %v1230_v29, %v1226_v27 }
 0xb7d   :  { %v1234_v31 = vmul.f32 0.044715, %v1232_v30 }
 0xb7e   :  { %v1227_v32 = vpop.f32.mrf.mxu0 }
 0xb7f   :  { %v1236_v33 = vadd.f32 %v1234_v31, %v1226_v27  ;;  %v1228_v34 = vadd.f32 %v1227_v32, %v1200_v60  ;;  %v1343_v31 = vperm.slane %v1542_v24, 0 }
 0xb81   :  { %v1238_v45 = vmul.f32 0.7978846, %v1236_v33  ;;  %v1231_v35 = vmul.f32 %v1228_v34, %v1228_v34 }
 0xb83   :  { %v1233_v36 = vmul.f32 %v1231_v35, %v1228_v34  ;;  %1703 = vtanh.f32 %v1238_v45 }
 0xb85   :  { %v1235_v62 = vmul.f32 0.044715, %v1233_v36 }
 0xb87   :  { %v1237_v25 = vadd.f32 %v1235_v62, %v1228_v34 }
 0xb89   :  { %v1239_v38 = vmul.f32 0.7978846, %v1237_v25  ;;  %v1704_v46 = vpop.eup %1703 }
 0xb8a   :  { %v1242_v39 = vadd.f32 1.0, %v1704_v46 }
 0xb8b   :  { %1705 = vtanh.f32 %v1239_v38  ;;  %v1355_v38 = vpop.permute.xlu0 %1354 }
 0xb8c   :  { %v1244_v41 = vmul.f32 0.5, %v1242_v39 }
 0xb8e   :  { %v1246_v42 = vmul.f32 %v1244_v41, %v1226_v27 }
 0xb91   :  { %v1706_v40 = vpop.eup %1705 }
 0xb92   :  { %v1243_v21 = vadd.f32 1.0, %v1706_v40 }
 0xb94   :  { %v1245_v26 = vmul.f32 0.5, %v1243_v21 }
 0xb96   :  { %v1247_v43 = vmul.f32 %v1245_v26, %v1228_v34 }
 0xb98   :  { %v1248_v44 = vpack.c.bf16 %v1247_v43, %v1246_v42 }
 0xb9a   :  { %1613 = vmatmul.msk.bf16.vlgmr.msrb.gmra.mxu1 %vm654_vm2, %v1248_v44 }
 0xc17   :  { %v1286_v49 = vpop.f32.mrf.mxu1 }
 0xc18   :  { %v1287_v50 = vadd.f32 %v1286_v49, %v1249_v47 }
 0xc1a   :  { %v1291_v52 = vadd.f32 %v1287_v50, %v1197_v16 }
 0xc1c   :  { %v1293_v53 = vsel %vm41_vm0, %v1291_v52, 0.0  ;;  %v1301_v58 = vmul.f32 %v1291_v52, %v1291_v52 }
 0xc1d   :  { %1294 = vadd.xlane.f32.xlu2 %v1293_v53 }
 0xc1e   :  { %v1303_v63 = vsel %vm41_vm0, %v1301_v58, 0.0 }
 0xc1f   :  { %v1288_v56 = vpop.f32.mrf.mxu1 }
 0xc20   :  { %v1289_v57 = vadd.f32 %v1288_v56, %v1249_v47 }
 0xc22   :  { %v2116_v28 = vadd.f32 %v1289_v57, %v1198_v17 }
 0xc24   :  { %v1296_v61 = vsel %vm41_vm0, %v2116_v28, 0.0  ;;  %v1302_v1 = vmul.f32 %v2116_v28, %v2116_v28 }
 0xc25   :  { %1297 = vadd.xlane.f32.xlu1 %v1296_v61  ;;  %1304 = vadd.xlane.f32.xlu2 %v1303_v63 }
 0xc26   :  { %v1306_v2 = vsel %vm41_vm0, %v1302_v1, 0.0 }
 0xc2d   :  { %1381 = vadd.xlane.f32.xlu2 %v1380_v0 }
 0xc35   :  { %1307 = vadd.xlane.f32.xlu2 %v1306_v2 }
 0xc4d   :  { %1361 = vperm.xlu2 %1645, %v1356_v3  }
 0xc90   :  { %v1295_v51 = vpop.xlane.xlu2 %1294 }
 0xc91   :  { %v1299_v4 = vmul.f32 %v1295_v51, %v1820_v14 }
 0xc93   :  { %v1311_v6 = vmul.f32 %v1299_v4, %v1299_v4  ;;  %v1317_v30 = vsub.f32 %v1291_v52, %v1299_v4 }
 0xc98   :  { %v1305_v5 = vpop.xlane.xlu2 %1304  ;;  %v1298_v12 = vpop.xlane.xlu1 %1297 }
 0xc99   :  { %v1309_v7 = vmul.f32 %v1305_v5, %v1820_v14  ;;  %v1300_v13 = vmul.f32 %v1298_v12, %v1820_v14 }
 0xc9b   :  { %v1313_v8 = vsub.f32 %v1309_v7, %v1311_v6  ;;  %v1312_v17 = vmul.f32 %v1300_v13, %v1300_v13  ;;  %v1318_v43 = vsub.f32 %v2116_v28, %v1300_v13 }
 0xc9d   :  { %v1315_v9 = vmax.f32 %v1313_v8, 0.0 }
 0xc9f   :  { %v1319_v10 = vadd.f32 1e-12, %v1315_v9 }
 0xca0   :  { %v1382_v11 = vpop.xlane.xlu2 %1381 }
 0xca1   :  { %1707 = vrsqrt.f32 %v1319_v10  ;;  %vm1327_vm2 = vweird.f32 %v1319_v10  ;;  %v2131_v33 = vmax.f32 %v1382_v11, 1e-09 }
 0xca3   :  { %v1385_v36 = vrot.slane %v2131_v33, 1  ;;  %vm1393_vm10 = vweird.f32 %v2131_v33  ;;  %v1397_v13 = vand.u32 2147483647, %v2131_v33 }
 0xca5   :  { %vm1408_vm11 = vweird.f32 %v1385_v36  ;;  %v1412_v5 = vand.u32 2147483647, %v1385_v36  ;;  %v1414_v6 = vand.u32 2147483648, %v1385_v36  ;;  %vm1398_vm14 = vcmp.eq.f32.partialorder %v1397_v13, 8.507059e+37 }
 0xca7   :  { %v1708_v15 = vpop.eup %1707  ;;  %vm1413_vm13 = vcmp.eq.f32.partialorder %v1412_v5, 8.507059e+37 }
 0xca8   :  { %v1322_v59 = vmul.f32 %v1708_v15, %v1319_v10  ;;  %v1308_v16 = vpop.xlane.xlu2 %1307  ;;  %vm1328_vm1 = vweird.f32 %v1708_v15  ;;  %v1399_v10 = vand.u32 2147483648, %v2131_v33 }
 0xca9   :  { %v1310_v18 = vmul.f32 %v1308_v16, %v1820_v14  ;;  %vm1329_vm3 = vmor %vm1327_vm2, %vm1328_vm1  ;;  %v1346_v14 = vperm.slane %v1542_v24, 1 }
 0xcaa   :  { %v1323_v19 = vmul.f32 %v1708_v15, %v1322_v59 }
 0xcab   :  { %v1314_v20 = vsub.f32 %v1310_v18, %v1312_v17 }
 0xcac   :  { %v1324_v22 = vmul.f32 0.5, %v1323_v19  ;;  %v1400_v19 = vor.u32 1.1754944e-38, %v1399_v10 }
 0xcad   :  { %v1316_v60 = vmax.f32 %v1314_v20, 0.0 }
 0xcae   :  { %v1325_v23 = vsub.f32 1.5, %v1324_v22 }
 0xcaf   :  { %v1320_v27 = vadd.f32 1e-12, %v1316_v60 }
 0xcb0   :  { %v1326_v29 = vmul.f32 %v1708_v15, %v1325_v23  ;;  %v1362_v54 = vpop.permute.xlu2 %1361 }
 0xcb1   :  { %1709 = vrsqrt.f32 %v1320_v27  ;;  %vm1337_vm5 = vweird.f32 %v1320_v27 }
 0xcb2   :  { %v1330_v32 = vsel %vm1329_vm3, %v1708_v15, %v1326_v29  ;;  %1711 = vrcp.f32 %v1385_v36  ;;  %v1415_v15 = vor.u32 1.1754944e-38, %v1414_v6 }
 0xcb3   :  { %v1341_v34 = vmul.f32 %v1330_v32, %v1317_v30  ;;  %1713 = vrcp.f32 %v2131_v33 }
 0xcb5   :  { %v1344_v45 = vmul.f32 %v1343_v31, %v1341_v34 }
 0xcb7   :  { %v1710_v35 = vpop.eup %1709  ;;  %v1347_v62 = vadd.f32 %v1346_v14, %v1344_v45 }
 0xcb8   :  { %v1332_v25 = vmul.f32 %v1710_v35, %v1320_v27  ;;  %vm1338_vm4 = vweird.f32 %v1710_v35  ;;  %v1712_v42 = vpop.eup %1711 }
 0xcb9   :  { %v1363_v39 = vmul.f32 %v1355_v38, %v1347_v62  ;;  %vm1339_vm6 = vmor %vm1337_vm5, %vm1338_vm4  ;;  %v1714_v48 = vpop.eup %1713  ;;  %v1404_v37 = vmul.f32 %v1712_v42, %v1385_v36  ;;  %vm1409_vm7 = vweird.f32 %v1712_v42 }
 0xcba   :  { %v1333_v46 = vmul.f32 %v1710_v35, %v1332_v25  ;;  %v1389_v52 = vmul.f32 %v1714_v48, %v2131_v33  ;;  %vm1394_vm8 = vweird.f32 %v1714_v48  ;;  %vm1410_vm9 = vmor %vm1408_vm11, %vm1409_vm7 }
 0xcbb   :  { %v1365_v21 = vsel %vm41_vm0, %v1363_v39, 0.0  ;;  %v1405_v56 = vsub.f32 1.0, %v1404_v37  ;;  %vm1395_vm12 = vmor %vm1393_vm10, %vm1394_vm8 }
 0xcbc   :  { %v1334_v40 = vmul.f32 0.5, %v1333_v46  ;;  %v1366_v44 = vrot.slane %v1365_v21, 4  ;;  %v1390_v58 = vsub.f32 1.0, %v1389_v52 }
 0xcbd   :  { %v1406_v0 = vmul.f32 %v1712_v42, %v1405_v56 }
 0xcbe   :  { %v1335_v41 = vsub.f32 1.5, %v1334_v40  ;;  %v1367_v53 = vadd.f32 %v1366_v44, %v1365_v21  ;;  %v1391_v3 = vmul.f32 %v1714_v48, %v1390_v58 }
 0xcbf   :  { %v1407_v51 = vadd.f32 %v1712_v42, %v1406_v0 }
 0xcc0   :  { %v1336_v26 = vmul.f32 %v1710_v35, %v1335_v41  ;;  %v1368_v61 = vrot.slane %v1367_v53, 2  ;;  %v1392_v9 = vadd.f32 %v1714_v48, %v1391_v3 }
 0xcc1   :  { %v1411_v11 = vsel %vm1410_vm9, %v1712_v42, %v1407_v51 }
 0xcc2   :  { %v1340_v47 = vsel %vm1339_vm6, %v1710_v35, %v1336_v26  ;;  %v1369_v1 = vadd.f32 %v1368_v61, %v1367_v53  ;;  %v1396_v17 = vsel %vm1395_vm12, %v1714_v48, %v1392_v9  ;;  %v1416_v18 = vsel %vm1413_vm13, %v1415_v15, %v1411_v11 }
 0xcc3   :  { %v1342_v49 = vmul.f32 %v1340_v47, %v1318_v43  ;;  %v1401_v22 = vsel %vm1398_vm14, %v1400_v19, %v1396_v17 }
 0xcc4   :  { %v1370_v7 = vrot.slane %v1369_v1, 1 }
 0xcc5   :  { %v1345_v50 = vmul.f32 %v1343_v31, %v1342_v49 }
 0xcc6   :  { %v1371_v59 = vadd.f32 %v1370_v7, %v1369_v1 }
 0xcc7   :  { %v1348_v55 = vadd.f32 %v1346_v14, %v1345_v50 }
 0xcc8   :  { %v1402_v60 = vmul.f32 %v1401_v22, %v1371_v59 }
 0xcc9   :  { %v1364_v57 = vmul.f32 %v1362_v54, %v1348_v55 }
 0xccb   :  { %v1372_v63 = vsel %vm41_vm0, %v1364_v57, 0.0 }
 0xccc   :  { %v1373_v28 = vrot.slane %v1372_v63, 4 }
 0xcce   :  { %v1374_v2 = vadd.f32 %v1373_v28, %v1372_v63 }
 0xcd0   :  { %v1375_v4 = vrot.slane %v1374_v2, 2 }
 0xcd2   :  { %v1376_v8 = vadd.f32 %v1375_v4, %v1374_v2 }
 0xcd4   :  { %v1377_v12 = vrot.slane %v1376_v8, 1 }
 0xcd6   :  { %v1378_v16 = vadd.f32 %v1377_v12, %v1376_v8 }
 0xcd8   :  { %v1417_v20 = vmul.f32 %v1416_v18, %v1378_v16 }
 0xcda   :  { %v1420_v23 = vrot.slane %v1417_v20, 7 }
 0xcdc   :  { %v1422_v24 = vsel %vm1421_vm15, %v1420_v23, %v1402_v60 }
 0xcdd   :  { %v1424_v27 = vsel %vm41_vm0, %v1422_v24, 0.0 }
 0xcde   :  { %1425 = vst [vmem:[#allocation2] sm:$0x3] %v1424_v27 }
 0xcdf   :  { %1436 = dma.vmem_to_hbm [thread:$0]  %s1432_s17, 32, %s1434_s20, [#allocation3]  }
 0xce0   :  { %1740 = dma.done.wait [#allocation3], 32  }
 0xce1   :  { %1741 = vsyncadd [#allocation3], 4294967264 }
 0xce2   :  { %1441 = vsyncpa [#allocation3], 1 }

</bundles_post_ra>
